<compile_context>
chip_gen: v7x
topology: tpu7x:2x2x1
jax: 0.10.0
libtpu: 0.0.40
codegen_flags: <defaults>
</compile_context>

<pallas_src>
import jax
import jax.numpy as jnp
from jax.experimental import pallas as pl
from jax.experimental.pallas import tpu as pltpu


def _lstm_model_kernel(x_ref,       # (T*B, F)   time-major, flattened, f32
                       wih1_ref,    # (F, 4*H1)  f32, gate order [i,f,o,g]
                       b1_ref,      # (1, 4*H1)  f32, b_ih + b_hh folded
                       wcomb_ref,   # (128, 4*H1 + 4*H2) bf16 skewed weights
                       b2_ref,      # (1, 4*H2)  f32, b_ih + b_hh folded
                       wfc1_ref,    # (H2, 32)
                       bfc1_ref,    # (1, 32)
                       wfc2_ref,    # (32, 1)
                       bfc2_ref,    # (1, 1)
                       out_ref,     # (B, 1)
                       hh_ref):     # scratch (B, 128) f32 lane-packed [h1 | h2 | 0]
    TB, F = x_ref.shape
    B = out_ref.shape[0]
    T = TB // B
    H1 = wih1_ref.shape[1] // 4
    H2 = b2_ref.shape[1] // 4
    G1 = 4 * H1
    G2 = 4 * H2

    # ---- Hoisted layer-1 input projection (off the serial chain, f32). ----
    gx1 = (jnp.dot(x_ref[...], wih1_ref[...],
                   preferred_element_type=jnp.float32)
           + b1_ref[...])                           # (T*B, 4*H1); step t = rows t*B:(t+1)*B

    wcomb = wcomb_ref[...]                          # (128, G1+G2) bf16, read once
    b2 = jnp.broadcast_to(b2_ref[...], (B, G2))     # hoisted broadcast

    def act(gates, H):
        # Gate order [i, f, o, g]: one sigmoid over the contiguous first 3H,
        # tanh only over the trailing H block.
        sg = jax.nn.sigmoid(gates[:, :3 * H])
        return (sg[:, 0 * H:1 * H], sg[:, 1 * H:2 * H], sg[:, 2 * H:3 * H],
                jnp.tanh(gates[:, 3 * H:4 * H]))

    # Persistent lane-packed recurrent state:
    #   hh[:, 0:H1]      = h1 of step k-1
    #   hh[:, H1:H1+H2]  = h2 of step k-2
    #   hh[:, H1+H2:128] = 0  (padding rows of W_comb are zero too)
    hh_ref[...] = jnp.zeros_like(hh_ref)

    c1 = jnp.zeros((B, H1), jnp.float32)
    c2 = jnp.zeros((B, H2), jnp.float32)
    h2_last = jnp.zeros((B, H2), jnp.float32)

    # ---- Prologue: layer-1 step 0 (h1^(-1)=0 => recurrent gates are 0). ----
    i1, f1, o1, g1 = act(gx1[0:B, :], H1)
    c1 = i1 * g1
    h1 = o1 * jnp.tanh(c1)
    hh_ref[:, 0:H1] = h1

    # ---- Skewed, fully-unrolled recurrence: T matmul pushes total. ----
    # Iteration k (1..T): the single matmul on [h1^(k-1) | h2^(k-2)] yields
    #   cols 0:G1   -> layer-1 recurrent gates of step k   (used while k < T)
    #   cols G1:end -> layer-2 full gates of step k-1      (always used)
    for k in range(1, T + 1):
        g_all = jnp.dot(hh_ref[...].astype(jnp.bfloat16), wcomb,
                        preferred_element_type=jnp.float32)   # (B, G1+G2)

        if k < T:
            # Layer-1 step k (on the critical chain).
            gates1 = g_all[:, :G1] + gx1[k * B:(k + 1) * B, :]
            i1, f1, o1, g1 = act(gates1, H1)
            c1 = f1 * c1 + i1 * g1
            h1 = o1 * jnp.tanh(c1)
            hh_ref[:, 0:H1] = h1

        # Layer-2 step k-1 (off the chain: consumed only two iterations later).
        gates2 = g_all[:, G1:G1 + G2] + b2
        i2, f2, o2, g2 = act(gates2, H2)
        c2 = f2 * c2 + i2 * g2
        h2_last = o2 * jnp.tanh(c2)
        hh_ref[:, H1:H1 + H2] = h2_last

    # ---- Head: fc1 -> ReLU -> fc2 (dropouts are identity in eval mode). ----
    hidden = jnp.maximum(
        jnp.dot(h2_last, wfc1_ref[...], preferred_element_type=jnp.float32)
        + bfc1_ref[...], 0.0)
    out_ref[...] = (jnp.dot(hidden, wfc2_ref[...],
                            preferred_element_type=jnp.float32)
                    + bfc2_ref[...])


@jax.jit
def lstm_model_forward(x, params):
    """x: (B, T, F) batch-first float32 (native PyTorch layout). Returns (B, 1)."""
    B, T, F = x.shape
    # Time-major flatten OUTSIDE the kernel (tiny XLA op) so the per-step read
    # inside the unrolled recurrence is a contiguous sublane slice.
    x_tm = jnp.transpose(x, (1, 0, 2)).reshape(T * B, F)

    args = (x_tm,
            params["wih1"], params["b1"],
            params["wcomb"], params["b2"],
            params["wfc1"], params["bfc1"],
            params["wfc2"], params["bfc2"])

    vmem = pl.BlockSpec(memory_space=pltpu.MemorySpace.VMEM)
    hpad = params["wcomb"].shape[0]          # lane-padded H1+H2 (=128)

    # Grid-less call: one TensorCore runs the whole (tiny, latency-bound)
    # recurrence; the whole working set (~150 KB) lives in VMEM.
    # TODO(synk): if B grows, add grid=(pl.cdiv(B, TB),) over batch with
    # dimension_semantics=("parallel",) to use v7x's second TensorCore.
    return pl.pallas_call(
        _lstm_model_kernel,
        out_shape=jax.ShapeDtypeStruct((B, 1), jnp.float32),
        in_specs=[vmem] * len(args),
        out_specs=vmem,
        scratch_shapes=[pltpu.VMEM((B, hpad), jnp.float32)],
    )(*args)


def init_params(key, input_size, lstm_units=64):
    """Deterministic synthetic parameters with PyTorch semantics.

    Stored pre-transposed (so math is x @ W), gate order [i, f, g, o] exactly
    as torch.nn.LSTM, with b_ih + b_hh folded into one bias per layer.
    """
    H1 = lstm_units
    H2 = lstm_units // 2
    ks = jax.random.split(key, 12)
    s = 0.1

    def nrm(k, shape):
        return (s * jax.random.normal(k, shape)).astype(jnp.float32)

    return {
        "wih1": nrm(ks[0], (input_size, 4 * H1)),
        "whh1": nrm(ks[1], (H1, 4 * H1)),
        "b1":   nrm(ks[2], (1, 4 * H1)) + nrm(ks[3], (1, 4 * H1)),
        "wih2": nrm(ks[4], (H1, 4 * H2)),
        "whh2": nrm(ks[5], (H2, 4 * H2)),
        "b2":   nrm(ks[6], (1, 4 * H2)) + nrm(ks[7], (1, 4 * H2)),
        "wfc1": nrm(ks[8], (H2, 32)),
        "bfc1": nrm(ks[9], (1, 32)),
        "wfc2": nrm(ks[10], (32, 1)),
        "bfc2": nrm(ks[11], (1, 1)),
    }


def pack_params(p):
    """One-time repack of PyTorch-style params for the kernel:
      * permute gate columns [i,f,g,o] -> [i,f,o,g] (contiguous sigmoid block);
      * build the skewed combined recurrent weight W_comb (128, 4H1+4H2):
          rows 0:H1     -> [ whh1 | wih2 ]
          rows H1:H1+H2 -> [  0   | whh2 ]
          rows H1+H2:   -> 0 (lane padding of the packed state)
      * store W_comb in bf16 (only weights on the serial MXU chain); gate and
        state elementwise math stays f32 inside the kernel.
    """
    H1 = p["whh1"].shape[0]
    H2 = p["whh2"].shape[0]
    G1, G2 = 4 * H1, 4 * H2

    def perm(w, H):
        # columns [i | f | g | o] -> [i | f | o | g]
        return jnp.concatenate(
            [w[..., 0 * H:1 * H], w[..., 1 * H:2 * H],
             w[..., 3 * H:4 * H], w[..., 2 * H:3 * H]], axis=-1)

    wih1 = perm(p["wih1"], H1)
    whh1 = perm(p["whh1"], H1)
    b1 = perm(p["b1"], H1)
    wih2 = perm(p["wih2"], H2)
    whh2 = perm(p["whh2"], H2)
    b2 = perm(p["b2"], H2)

    hpad = ((H1 + H2 + 127) // 128) * 128
    wcomb = jnp.zeros((hpad, G1 + G2), jnp.float32)
    wcomb = wcomb.at[:H1, :G1].set(whh1)
    wcomb = wcomb.at[:H1, G1:].set(wih2)
    wcomb = wcomb.at[H1:H1 + H2, G1:].set(whh2)

    return {
        "wih1": wih1, "b1": b1,
        "wcomb": wcomb.astype(jnp.bfloat16),
        "b2": b2,
        "wfc1": p["wfc1"], "bfc1": p["bfc1"],
        "wfc2": p["wfc2"], "bfc2": p["bfc2"],
    }


def _reference_forward(x, p):
    """Pure-JAX f32 reference of the PyTorch math (standard [i,f,g,o] order)."""
    B, T, F = x.shape
    H1 = p["whh1"].shape[0]
    H2 = p["whh2"].shape[0]

    def cell(x_t, h, c, wih, whh, b, H):
        g = x_t @ wih + h @ whh + b
        i = jax.nn.sigmoid(g[:, :H])
        f = jax.nn.sigmoid(g[:, H:2 * H])
        gg = jnp.tanh(g[:, 2 * H:3 * H])
        o = jax.nn.sigmoid(g[:, 3 * H:])
        c = f * c + i * gg
        return o * jnp.tanh(c), c

    h1 = c1 = jnp.zeros((B, H1), jnp.float32)
    h2 = c2 = jnp.zeros((B, H2), jnp.float32)
    for t in range(T):
        h1, c1 = cell(x[:, t, :], h1, c1, p["wih1"], p["whh1"], p["b1"], H1)
        h2, c2 = cell(h1, h2, c2, p["wih2"], p["whh2"], p["b2"], H2)
    hid = jnp.maximum(h2 @ p["wfc1"] + p["bfc1"], 0.0)
    return hid @ p["wfc2"] + p["bfc2"]


if __name__ == "__main__":
    B, T, F = 2, 8, 8          # batch, seq_len, input_size
    LSTM_UNITS = 64

    key = jax.random.PRNGKey(0)
    kx, kp = jax.random.split(key)
    x = jax.random.normal(kx, (B, T, F), dtype=jnp.float32)

    raw_params = init_params(kp, input_size=F, lstm_units=LSTM_UNITS)
    params = pack_params(raw_params)

    out = lstm_model_forward(x, params)
    out = jax.block_until_ready(out)

    ref = _reference_forward(x, raw_params)
    assert out.shape == (B, 1)
    # bf16 operands on the recurrent matmul (f32 accumulation / gate math)
    # => slightly looser tolerance than a pure-f32 check.
    assert jnp.allclose(out, ref, rtol=2e-2, atol=5e-3), (out, ref)

    print("KERNEL_OK")
</pallas_src>

<mosaic_0001>
module attributes {stable_mosaic.version = 11 : i64} {
  func.func @_lstm_model_kernel(%arg0: memref<16x8xf32, #tpu.memory_space<vmem>>, %arg1: memref<8x256xf32, #tpu.memory_space<vmem>>, %arg2: memref<1x256xf32, #tpu.memory_space<vmem>>, %arg3: memref<128x384xbf16, #tpu.memory_space<vmem>>, %arg4: memref<1x128xf32, #tpu.memory_space<vmem>>, %arg5: memref<32x32xf32, #tpu.memory_space<vmem>>, %arg6: memref<1x32xf32, #tpu.memory_space<vmem>>, %arg7: memref<32x1xf32, #tpu.memory_space<vmem>>, %arg8: memref<1x1xf32, #tpu.memory_space<vmem>>, %arg9: memref<2x1xf32, #tpu.memory_space<vmem>>, %arg10: memref<2x128xf32, #tpu.memory_space<vmem>>) attributes {dimension_semantics = [], scalar_prefetch = 0 : i64, scratch_operands = 1 : i64, tpu.core_type = #tpu.core_type<tc>} {
    %c0 = arith.constant 0 : index
    %c0_0 = arith.constant 0 : index
    %0 = vector.load %arg0[%c0, %c0_0] : memref<16x8xf32, #tpu.memory_space<vmem>>, vector<16x8xf32>
    %c0_1 = arith.constant 0 : index
    %c0_2 = arith.constant 0 : index
    %1 = vector.load %arg1[%c0_1, %c0_2] : memref<8x256xf32, #tpu.memory_space<vmem>>, vector<8x256xf32>
    %cst = arith.constant dense<0.000000e+00> : vector<16x256xf32>
    %2 = tpu.matmul %0, %1, %cst {dimension_numbers = #tpu.dot_dimension_numbers<[1], [0], [0], [1], [0, 0, 1, 1], [], []>} : vector<16x8xf32>, vector<8x256xf32>, vector<16x256xf32> -> vector<16x256xf32>
    %c0_3 = arith.constant 0 : index
    %c0_4 = arith.constant 0 : index
    %3 = vector.load %arg2[%c0_3, %c0_4] : memref<1x256xf32, #tpu.memory_space<vmem>>, vector<1x256xf32>
    %4 = vector.broadcast %3 : vector<1x256xf32> to vector<16x256xf32>
    %5 = arith.addf %2, %4 : vector<16x256xf32>
    %c0_5 = arith.constant 0 : index
    %c0_6 = arith.constant 0 : index
    %6 = vector.load %arg3[%c0_5, %c0_6] : memref<128x384xbf16, #tpu.memory_space<vmem>>, vector<128x384xbf16>
    %c0_7 = arith.constant 0 : index
    %c0_8 = arith.constant 0 : index
    %7 = vector.load %arg4[%c0_7, %c0_8] : memref<1x128xf32, #tpu.memory_space<vmem>>, vector<1x128xf32>
    %8 = vector.shape_cast %7 : vector<1x128xf32> to vector<1x128xf32>
    %9 = vector.broadcast %8 : vector<1x128xf32> to vector<2x128xf32>
    %cst_9 = arith.constant 0.000000e+00 : f32
    %10 = vector.broadcast %cst_9 : f32 to vector<2x128xf32>
    %c0_10 = arith.constant 0 : index
    %c0_11 = arith.constant 0 : index
    %11 = vector.load %arg10[%c0_10, %c0_11] : memref<2x128xf32, #tpu.memory_space<vmem>>, vector<2x128xf32>
    tpu.vector_store %arg10[%c0_10, %c0_11], %10 {strides = array<i32>} : memref<2x128xf32, #tpu.memory_space<vmem>>, vector<2x128xf32>,
    %cst_12 = arith.constant 0.000000e+00 : f32
    %12 = vector.broadcast %cst_12 : f32 to vector<2x32xf32>
    %13 = vector.extract_strided_slice %5 {offsets = [0, 0], sizes = [2, 256], strides = [1, 1]} : vector<16x256xf32> to vector<2x256xf32>
    %14 = vector.extract_strided_slice %13 {offsets = [0, 0], sizes = [2, 192], strides = [1, 1]} : vector<2x256xf32> to vector<2x192xf32>
    %15 = arith.negf %14 : vector<2x192xf32>
    %16 = math.exp %15 : vector<2x192xf32>
    %cst_13 = arith.constant 1.000000e+00 : f32
    %17 = vector.broadcast %cst_13 : f32 to vector<2x192xf32>
    %18 = arith.addf %17, %16 : vector<2x192xf32>
    %19 = arith.divf %17, %18 : vector<2x192xf32>
    %20 = vector.extract_strided_slice %19 {offsets = [0, 0], sizes = [2, 64], strides = [1, 1]} : vector<2x192xf32> to vector<2x64xf32>
    %21 = vector.extract_strided_slice %19 {offsets = [0, 128], sizes = [2, 64], strides = [1, 1]} : vector<2x192xf32> to vector<2x64xf32>
    %22 = vector.extract_strided_slice %13 {offsets = [0, 192], sizes = [2, 64], strides = [1, 1]} : vector<2x256xf32> to vector<2x64xf32>
    %23 = math.tanh %22 : vector<2x64xf32>
    %24 = arith.mulf %20, %23 : vector<2x64xf32>
    %25 = math.tanh %24 : vector<2x64xf32>
    %26 = arith.mulf %21, %25 : vector<2x64xf32>
    %c0_14 = arith.constant 0 : index
    %c0_15 = arith.constant 0 : index
    %27 = vector.load %arg10[%c0_14, %c0_15] : memref<2x128xf32, #tpu.memory_space<vmem>>, vector<2x64xf32>
    tpu.vector_store %arg10[%c0_14, %c0_15], %26 {strides = array<i32>} : memref<2x128xf32, #tpu.memory_space<vmem>>, vector<2x64xf32>,
    %c0_16 = arith.constant 0 : index
    %c0_17 = arith.constant 0 : index
    %28 = vector.load %arg10[%c0_16, %c0_17] : memref<2x128xf32, #tpu.memory_space<vmem>>, vector<2x128xf32>
    %29 = arith.truncf %28 : vector<2x128xf32> to vector<2x128xbf16>
    %cst_18 = arith.constant dense<0.000000e+00> : vector<2x384xf32>
    %30 = tpu.matmul %29, %6, %cst_18 {dimension_numbers = #tpu.dot_dimension_numbers<[1], [0], [0], [1], [0, 0, 1, 1], [], []>} : vector<2x128xbf16>, vector<128x384xbf16>, vector<2x384xf32> -> vector<2x384xf32>
    %31 = vector.extract_strided_slice %30 {offsets = [0, 0], sizes = [2, 256], strides = [1, 1]} : vector<2x384xf32> to vector<2x256xf32>
    %32 = vector.extract_strided_slice %5 {offsets = [2, 0], sizes = [2, 256], strides = [1, 1]} : vector<16x256xf32> to vector<2x256xf32>
    %33 = arith.addf %31, %32 : vector<2x256xf32>
    %34 = vector.extract_strided_slice %33 {offsets = [0, 0], sizes = [2, 192], strides = [1, 1]} : vector<2x256xf32> to vector<2x192xf32>
    %35 = arith.negf %34 : vector<2x192xf32>
    %36 = math.exp %35 : vector<2x192xf32>
    %cst_19 = arith.constant 1.000000e+00 : f32
    %37 = vector.broadcast %cst_19 : f32 to vector<2x192xf32>
    %38 = arith.addf %37, %36 : vector<2x192xf32>
    %39 = arith.divf %37, %38 : vector<2x192xf32>
    %40 = vector.extract_strided_slice %39 {offsets = [0, 0], sizes = [2, 64], strides = [1, 1]} : vector<2x192xf32> to vector<2x64xf32>
    %41 = vector.extract_strided_slice %39 {offsets = [0, 64], sizes = [2, 64], strides = [1, 1]} : vector<2x192xf32> to vector<2x64xf32>
    %42 = vector.extract_strided_slice %39 {offsets = [0, 128], sizes = [2, 64], strides = [1, 1]} : vector<2x192xf32> to vector<2x64xf32>
    %43 = vector.extract_strided_slice %33 {offsets = [0, 192], sizes = [2, 64], strides = [1, 1]} : vector<2x256xf32> to vector<2x64xf32>
    %44 = math.tanh %43 : vector<2x64xf32>
    %45 = arith.mulf %41, %24 : vector<2x64xf32>
    %46 = arith.mulf %40, %44 : vector<2x64xf32>
    %47 = arith.addf %45, %46 : vector<2x64xf32>
    %48 = math.tanh %47 : vector<2x64xf32>
    %49 = arith.mulf %42, %48 : vector<2x64xf32>
    %c0_20 = arith.constant 0 : index
    %c0_21 = arith.constant 0 : index
    %50 = vector.load %arg10[%c0_20, %c0_21] : memref<2x128xf32, #tpu.memory_space<vmem>>, vector<2x64xf32>
    tpu.vector_store %arg10[%c0_20, %c0_21], %49 {strides = array<i32>} : memref<2x128xf32, #tpu.memory_space<vmem>>, vector<2x64xf32>,
    %51 = vector.extract_strided_slice %30 {offsets = [0, 256], sizes = [2, 128], strides = [1, 1]} : vector<2x384xf32> to vector<2x128xf32>
    %52 = arith.addf %51, %9 : vector<2x128xf32>
    %53 = vector.extract_strided_slice %52 {offsets = [0, 0], sizes = [2, 96], strides = [1, 1]} : vector<2x128xf32> to vector<2x96xf32>
    %54 = arith.negf %53 : vector<2x96xf32>
    %55 = math.exp %54 : vector<2x96xf32>
    %cst_22 = arith.constant 1.000000e+00 : f32
    %56 = vector.broadcast %cst_22 : f32 to vector<2x96xf32>
    %57 = arith.addf %56, %55 : vector<2x96xf32>
    %58 = arith.divf %56, %57 : vector<2x96xf32>
    %59 = vector.extract_strided_slice %58 {offsets = [0, 0], sizes = [2, 32], strides = [1, 1]} : vector<2x96xf32> to vector<2x32xf32>
    %60 = vector.extract_strided_slice %58 {offsets = [0, 32], sizes = [2, 32], strides = [1, 1]} : vector<2x96xf32> to vector<2x32xf32>
    %61 = vector.extract_strided_slice %58 {offsets = [0, 64], sizes = [2, 32], strides = [1, 1]} : vector<2x96xf32> to vector<2x32xf32>
    %62 = vector.extract_strided_slice %52 {offsets = [0, 96], sizes = [2, 32], strides = [1, 1]} : vector<2x128xf32> to vector<2x32xf32>
    %63 = math.tanh %62 : vector<2x32xf32>
    %64 = arith.mulf %60, %12 : vector<2x32xf32>
    %65 = arith.mulf %59, %63 : vector<2x32xf32>
    %66 = arith.addf %64, %65 : vector<2x32xf32>
    %67 = math.tanh %66 : vector<2x32xf32>
    %68 = arith.mulf %61, %67 : vector<2x32xf32>
    %c0_23 = arith.constant 0 : index
    %c64 = arith.constant 64 : index
    %69 = vector.load %arg10[%c0_23, %c64] : memref<2x128xf32, #tpu.memory_space<vmem>>, vector<2x32xf32>
    tpu.vector_store %arg10[%c0_23, %c64], %68 {strides = array<i32>} : memref<2x128xf32, #tpu.memory_space<vmem>>, vector<2x32xf32>,
    %c0_24 = arith.constant 0 : index
    %c0_25 = arith.constant 0 : index
    %70 = vector.load %arg10[%c0_24, %c0_25] : memref<2x128xf32, #tpu.memory_space<vmem>>, vector<2x128xf32>
    %71 = arith.truncf %70 : vector<2x128xf32> to vector<2x128xbf16>
    %cst_26 = arith.constant dense<0.000000e+00> : vector<2x384xf32>
    %72 = tpu.matmul %71, %6, %cst_26 {dimension_numbers = #tpu.dot_dimension_numbers<[1], [0], [0], [1], [0, 0, 1, 1], [], []>} : vector<2x128xbf16>, vector<128x384xbf16>, vector<2x384xf32> -> vector<2x384xf32>
    %73 = vector.extract_strided_slice %72 {offsets = [0, 0], sizes = [2, 256], strides = [1, 1]} : vector<2x384xf32> to vector<2x256xf32>
    %74 = vector.extract_strided_slice %5 {offsets = [4, 0], sizes = [2, 256], strides = [1, 1]} : vector<16x256xf32> to vector<2x256xf32>
    %75 = arith.addf %73, %74 : vector<2x256xf32>
    %76 = vector.extract_strided_slice %75 {offsets = [0, 0], sizes = [2, 192], strides = [1, 1]} : vector<2x256xf32> to vector<2x192xf32>
    %77 = arith.negf %76 : vector<2x192xf32>
    %78 = math.exp %77 : vector<2x192xf32>
    %cst_27 = arith.constant 1.000000e+00 : f32
    %79 = vector.broadcast %cst_27 : f32 to vector<2x192xf32>
    %80 = arith.addf %79, %78 : vector<2x192xf32>
    %81 = arith.divf %79, %80 : vector<2x192xf32>
    %82 = vector.extract_strided_slice %81 {offsets = [0, 0], sizes = [2, 64], strides = [1, 1]} : vector<2x192xf32> to vector<2x64xf32>
    %83 = vector.extract_strided_slice %81 {offsets = [0, 64], sizes = [2, 64], strides = [1, 1]} : vector<2x192xf32> to vector<2x64xf32>
    %84 = vector.extract_strided_slice %81 {offsets = [0, 128], sizes = [2, 64], strides = [1, 1]} : vector<2x192xf32> to vector<2x64xf32>
    %85 = vector.extract_strided_slice %75 {offsets = [0, 192], sizes = [2, 64], strides = [1, 1]} : vector<2x256xf32> to vector<2x64xf32>
    %86 = math.tanh %85 : vector<2x64xf32>
    %87 = arith.mulf %83, %47 : vector<2x64xf32>
    %88 = arith.mulf %82, %86 : vector<2x64xf32>
    %89 = arith.addf %87, %88 : vector<2x64xf32>
    %90 = math.tanh %89 : vector<2x64xf32>
    %91 = arith.mulf %84, %90 : vector<2x64xf32>
    %c0_28 = arith.constant 0 : index
    %c0_29 = arith.constant 0 : index
    %92 = vector.load %arg10[%c0_28, %c0_29] : memref<2x128xf32, #tpu.memory_space<vmem>>, vector<2x64xf32>
    tpu.vector_store %arg10[%c0_28, %c0_29], %91 {strides = array<i32>} : memref<2x128xf32, #tpu.memory_space<vmem>>, vector<2x64xf32>,
    %93 = vector.extract_strided_slice %72 {offsets = [0, 256], sizes = [2, 128], strides = [1, 1]} : vector<2x384xf32> to vector<2x128xf32>
    %94 = arith.addf %93, %9 : vector<2x128xf32>
    %95 = vector.extract_strided_slice %94 {offsets = [0, 0], sizes = [2, 96], strides = [1, 1]} : vector<2x128xf32> to vector<2x96xf32>
    %96 = arith.negf %95 : vector<2x96xf32>
    %97 = math.exp %96 : vector<2x96xf32>
    %cst_30 = arith.constant 1.000000e+00 : f32
    %98 = vector.broadcast %cst_30 : f32 to vector<2x96xf32>
    %99 = arith.addf %98, %97 : vector<2x96xf32>
    %100 = arith.divf %98, %99 : vector<2x96xf32>
    %101 = vector.extract_strided_slice %100 {offsets = [0, 0], sizes = [2, 32], strides = [1, 1]} : vector<2x96xf32> to vector<2x32xf32>
    %102 = vector.extract_strided_slice %100 {offsets = [0, 32], sizes = [2, 32], strides = [1, 1]} : vector<2x96xf32> to vector<2x32xf32>
    %103 = vector.extract_strided_slice %100 {offsets = [0, 64], sizes = [2, 32], strides = [1, 1]} : vector<2x96xf32> to vector<2x32xf32>
    %104 = vector.extract_strided_slice %94 {offsets = [0, 96], sizes = [2, 32], strides = [1, 1]} : vector<2x128xf32> to vector<2x32xf32>
    %105 = math.tanh %104 : vector<2x32xf32>
    %106 = arith.mulf %102, %66 : vector<2x32xf32>
    %107 = arith.mulf %101, %105 : vector<2x32xf32>
    %108 = arith.addf %106, %107 : vector<2x32xf32>
    %109 = math.tanh %108 : vector<2x32xf32>
    %110 = arith.mulf %103, %109 : vector<2x32xf32>
    %c0_31 = arith.constant 0 : index
    %c64_32 = arith.constant 64 : index
    %111 = vector.load %arg10[%c0_31, %c64_32] : memref<2x128xf32, #tpu.memory_space<vmem>>, vector<2x32xf32>
    tpu.vector_store %arg10[%c0_31, %c64_32], %110 {strides = array<i32>} : memref<2x128xf32, #tpu.memory_space<vmem>>, vector<2x32xf32>,
    %c0_33 = arith.constant 0 : index
    %c0_34 = arith.constant 0 : index
    %112 = vector.load %arg10[%c0_33, %c0_34] : memref<2x128xf32, #tpu.memory_space<vmem>>, vector<2x128xf32>
    %113 = arith.truncf %112 : vector<2x128xf32> to vector<2x128xbf16>
    %cst_35 = arith.constant dense<0.000000e+00> : vector<2x384xf32>
    %114 = tpu.matmul %113, %6, %cst_35 {dimension_numbers = #tpu.dot_dimension_numbers<[1], [0], [0], [1], [0, 0, 1, 1], [], []>} : vector<2x128xbf16>, vector<128x384xbf16>, vector<2x384xf32> -> vector<2x384xf32>
    %115 = vector.extract_strided_slice %114 {offsets = [0, 0], sizes = [2, 256], strides = [1, 1]} : vector<2x384xf32> to vector<2x256xf32>
    %116 = vector.extract_strided_slice %5 {offsets = [6, 0], sizes = [2, 256], strides = [1, 1]} : vector<16x256xf32> to vector<2x256xf32>
    %117 = arith.addf %115, %116 : vector<2x256xf32>
    %118 = vector.extract_strided_slice %117 {offsets = [0, 0], sizes = [2, 192], strides = [1, 1]} : vector<2x256xf32> to vector<2x192xf32>
    %119 = arith.negf %118 : vector<2x192xf32>
    %120 = math.exp %119 : vector<2x192xf32>
    %cst_36 = arith.constant 1.000000e+00 : f32
    %121 = vector.broadcast %cst_36 : f32 to vector<2x192xf32>
    %122 = arith.addf %121, %120 : vector<2x192xf32>
    %123 = arith.divf %121, %122 : vector<2x192xf32>
    %124 = vector.extract_strided_slice %123 {offsets = [0, 0], sizes = [2, 64], strides = [1, 1]} : vector<2x192xf32> to vector<2x64xf32>
    %125 = vector.extract_strided_slice %123 {offsets = [0, 64], sizes = [2, 64], strides = [1, 1]} : vector<2x192xf32> to vector<2x64xf32>
    %126 = vector.extract_strided_slice %123 {offsets = [0, 128], sizes = [2, 64], strides = [1, 1]} : vector<2x192xf32> to vector<2x64xf32>
    %127 = vector.extract_strided_slice %117 {offsets = [0, 192], sizes = [2, 64], strides = [1, 1]} : vector<2x256xf32> to vector<2x64xf32>
    %128 = math.tanh %127 : vector<2x64xf32>
    %129 = arith.mulf %125, %89 : vector<2x64xf32>
    %130 = arith.mulf %124, %128 : vector<2x64xf32>
    %131 = arith.addf %129, %130 : vector<2x64xf32>
    %132 = math.tanh %131 : vector<2x64xf32>
    %133 = arith.mulf %126, %132 : vector<2x64xf32>
    %c0_37 = arith.constant 0 : index
    %c0_38 = arith.constant 0 : index
    %134 = vector.load %arg10[%c0_37, %c0_38] : memref<2x128xf32, #tpu.memory_space<vmem>>, vector<2x64xf32>
    tpu.vector_store %arg10[%c0_37, %c0_38], %133 {strides = array<i32>} : memref<2x128xf32, #tpu.memory_space<vmem>>, vector<2x64xf32>,
    %135 = vector.extract_strided_slice %114 {offsets = [0, 256], sizes = [2, 128], strides = [1, 1]} : vector<2x384xf32> to vector<2x128xf32>
    %136 = arith.addf %135, %9 : vector<2x128xf32>
    %137 = vector.extract_strided_slice %136 {offsets = [0, 0], sizes = [2, 96], strides = [1, 1]} : vector<2x128xf32> to vector<2x96xf32>
    %138 = arith.negf %137 : vector<2x96xf32>
    %139 = math.exp %138 : vector<2x96xf32>
    %cst_39 = arith.constant 1.000000e+00 : f32
    %140 = vector.broadcast %cst_39 : f32 to vector<2x96xf32>
    %141 = arith.addf %140, %139 : vector<2x96xf32>
    %142 = arith.divf %140, %141 : vector<2x96xf32>
    %143 = vector.extract_strided_slice %142 {offsets = [0, 0], sizes = [2, 32], strides = [1, 1]} : vector<2x96xf32> to vector<2x32xf32>
    %144 = vector.extract_strided_slice %142 {offsets = [0, 32], sizes = [2, 32], strides = [1, 1]} : vector<2x96xf32> to vector<2x32xf32>
    %145 = vector.extract_strided_slice %142 {offsets = [0, 64], sizes = [2, 32], strides = [1, 1]} : vector<2x96xf32> to vector<2x32xf32>
    %146 = vector.extract_strided_slice %136 {offsets = [0, 96], sizes = [2, 32], strides = [1, 1]} : vector<2x128xf32> to vector<2x32xf32>
    %147 = math.tanh %146 : vector<2x32xf32>
    %148 = arith.mulf %144, %108 : vector<2x32xf32>
    %149 = arith.mulf %143, %147 : vector<2x32xf32>
    %150 = arith.addf %148, %149 : vector<2x32xf32>
    %151 = math.tanh %150 : vector<2x32xf32>
    %152 = arith.mulf %145, %151 : vector<2x32xf32>
    %c0_40 = arith.constant 0 : index
    %c64_41 = arith.constant 64 : index
    %153 = vector.load %arg10[%c0_40, %c64_41] : memref<2x128xf32, #tpu.memory_space<vmem>>, vector<2x32xf32>
    tpu.vector_store %arg10[%c0_40, %c64_41], %152 {strides = array<i32>} : memref<2x128xf32, #tpu.memory_space<vmem>>, vector<2x32xf32>,
    %c0_42 = arith.constant 0 : index
    %c0_43 = arith.constant 0 : index
    %154 = vector.load %arg10[%c0_42, %c0_43] : memref<2x128xf32, #tpu.memory_space<vmem>>, vector<2x128xf32>
    %155 = arith.truncf %154 : vector<2x128xf32> to vector<2x128xbf16>
    %cst_44 = arith.constant dense<0.000000e+00> : vector<2x384xf32>
    %156 = tpu.matmul %155, %6, %cst_44 {dimension_numbers = #tpu.dot_dimension_numbers<[1], [0], [0], [1], [0, 0, 1, 1], [], []>} : vector<2x128xbf16>, vector<128x384xbf16>, vector<2x384xf32> -> vector<2x384xf32>
    %157 = vector.extract_strided_slice %156 {offsets = [0, 0], sizes = [2, 256], strides = [1, 1]} : vector<2x384xf32> to vector<2x256xf32>
    %158 = vector.extract_strided_slice %5 {offsets = [8, 0], sizes = [2, 256], strides = [1, 1]} : vector<16x256xf32> to vector<2x256xf32>
    %159 = arith.addf %157, %158 : vector<2x256xf32>
    %160 = vector.extract_strided_slice %159 {offsets = [0, 0], sizes = [2, 192], strides = [1, 1]} : vector<2x256xf32> to vector<2x192xf32>
    %161 = arith.negf %160 : vector<2x192xf32>
    %162 = math.exp %161 : vector<2x192xf32>
    %cst_45 = arith.constant 1.000000e+00 : f32
    %163 = vector.broadcast %cst_45 : f32 to vector<2x192xf32>
    %164 = arith.addf %163, %162 : vector<2x192xf32>
    %165 = arith.divf %163, %164 : vector<2x192xf32>
    %166 = vector.extract_strided_slice %165 {offsets = [0, 0], sizes = [2, 64], strides = [1, 1]} : vector<2x192xf32> to vector<2x64xf32>
    %167 = vector.extract_strided_slice %165 {offsets = [0, 64], sizes = [2, 64], strides = [1, 1]} : vector<2x192xf32> to vector<2x64xf32>
    %168 = vector.extract_strided_slice %165 {offsets = [0, 128], sizes = [2, 64], strides = [1, 1]} : vector<2x192xf32> to vector<2x64xf32>
    %169 = vector.extract_strided_slice %159 {offsets = [0, 192], sizes = [2, 64], strides = [1, 1]} : vector<2x256xf32> to vector<2x64xf32>
    %170 = math.tanh %169 : vector<2x64xf32>
    %171 = arith.mulf %167, %131 : vector<2x64xf32>
    %172 = arith.mulf %166, %170 : vector<2x64xf32>
    %173 = arith.addf %171, %172 : vector<2x64xf32>
    %174 = math.tanh %173 : vector<2x64xf32>
    %175 = arith.mulf %168, %174 : vector<2x64xf32>
    %c0_46 = arith.constant 0 : index
    %c0_47 = arith.constant 0 : index
    %176 = vector.load %arg10[%c0_46, %c0_47] : memref<2x128xf32, #tpu.memory_space<vmem>>, vector<2x64xf32>
    tpu.vector_store %arg10[%c0_46, %c0_47], %175 {strides = array<i32>} : memref<2x128xf32, #tpu.memory_space<vmem>>, vector<2x64xf32>,
    %177 = vector.extract_strided_slice %156 {offsets = [0, 256], sizes = [2, 128], strides = [1, 1]} : vector<2x384xf32> to vector<2x128xf32>
    %178 = arith.addf %177, %9 : vector<2x128xf32>
    %179 = vector.extract_strided_slice %178 {offsets = [0, 0], sizes = [2, 96], strides = [1, 1]} : vector<2x128xf32> to vector<2x96xf32>
    %180 = arith.negf %179 : vector<2x96xf32>
    %181 = math.exp %180 : vector<2x96xf32>
    %cst_48 = arith.constant 1.000000e+00 : f32
    %182 = vector.broadcast %cst_48 : f32 to vector<2x96xf32>
    %183 = arith.addf %182, %181 : vector<2x96xf32>
    %184 = arith.divf %182, %183 : vector<2x96xf32>
    %185 = vector.extract_strided_slice %184 {offsets = [0, 0], sizes = [2, 32], strides = [1, 1]} : vector<2x96xf32> to vector<2x32xf32>
    %186 = vector.extract_strided_slice %184 {offsets = [0, 32], sizes = [2, 32], strides = [1, 1]} : vector<2x96xf32> to vector<2x32xf32>
    %187 = vector.extract_strided_slice %184 {offsets = [0, 64], sizes = [2, 32], strides = [1, 1]} : vector<2x96xf32> to vector<2x32xf32>
    %188 = vector.extract_strided_slice %178 {offsets = [0, 96], sizes = [2, 32], strides = [1, 1]} : vector<2x128xf32> to vector<2x32xf32>
    %189 = math.tanh %188 : vector<2x32xf32>
    %190 = arith.mulf %186, %150 : vector<2x32xf32>
    %191 = arith.mulf %185, %189 : vector<2x32xf32>
    %192 = arith.addf %190, %191 : vector<2x32xf32>
    %193 = math.tanh %192 : vector<2x32xf32>
    %194 = arith.mulf %187, %193 : vector<2x32xf32>
    %c0_49 = arith.constant 0 : index
    %c64_50 = arith.constant 64 : index
    %195 = vector.load %arg10[%c0_49, %c64_50] : memref<2x128xf32, #tpu.memory_space<vmem>>, vector<2x32xf32>
    tpu.vector_store %arg10[%c0_49, %c64_50], %194 {strides = array<i32>} : memref<2x128xf32, #tpu.memory_space<vmem>>, vector<2x32xf32>,
    %c0_51 = arith.constant 0 : index
    %c0_52 = arith.constant 0 : index
    %196 = vector.load %arg10[%c0_51, %c0_52] : memref<2x128xf32, #tpu.memory_space<vmem>>, vector<2x128xf32>
    %197 = arith.truncf %196 : vector<2x128xf32> to vector<2x128xbf16>
    %cst_53 = arith.constant dense<0.000000e+00> : vector<2x384xf32>
    %198 = tpu.matmul %197, %6, %cst_53 {dimension_numbers = #tpu.dot_dimension_numbers<[1], [0], [0], [1], [0, 0, 1, 1], [], []>} : vector<2x128xbf16>, vector<128x384xbf16>, vector<2x384xf32> -> vector<2x384xf32>
    %199 = vector.extract_strided_slice %198 {offsets = [0, 0], sizes = [2, 256], strides = [1, 1]} : vector<2x384xf32> to vector<2x256xf32>
    %200 = vector.extract_strided_slice %5 {offsets = [10, 0], sizes = [2, 256], strides = [1, 1]} : vector<16x256xf32> to vector<2x256xf32>
    %201 = arith.addf %199, %200 : vector<2x256xf32>
    %202 = vector.extract_strided_slice %201 {offsets = [0, 0], sizes = [2, 192], strides = [1, 1]} : vector<2x256xf32> to vector<2x192xf32>
    %203 = arith.negf %202 : vector<2x192xf32>
    %204 = math.exp %203 : vector<2x192xf32>
    %cst_54 = arith.constant 1.000000e+00 : f32
    %205 = vector.broadcast %cst_54 : f32 to vector<2x192xf32>
    %206 = arith.addf %205, %204 : vector<2x192xf32>
    %207 = arith.divf %205, %206 : vector<2x192xf32>
    %208 = vector.extract_strided_slice %207 {offsets = [0, 0], sizes = [2, 64], strides = [1, 1]} : vector<2x192xf32> to vector<2x64xf32>
    %209 = vector.extract_strided_slice %207 {offsets = [0, 64], sizes = [2, 64], strides = [1, 1]} : vector<2x192xf32> to vector<2x64xf32>
    %210 = vector.extract_strided_slice %207 {offsets = [0, 128], sizes = [2, 64], strides = [1, 1]} : vector<2x192xf32> to vector<2x64xf32>
    %211 = vector.extract_strided_slice %201 {offsets = [0, 192], sizes = [2, 64], strides = [1, 1]} : vector<2x256xf32> to vector<2x64xf32>
    %212 = math.tanh %211 : vector<2x64xf32>
    %213 = arith.mulf %209, %173 : vector<2x64xf32>
    %214 = arith.mulf %208, %212 : vector<2x64xf32>
    %215 = arith.addf %213, %214 : vector<2x64xf32>
    %216 = math.tanh %215 : vector<2x64xf32>
    %217 = arith.mulf %210, %216 : vector<2x64xf32>
    %c0_55 = arith.constant 0 : index
    %c0_56 = arith.constant 0 : index
    %218 = vector.load %arg10[%c0_55, %c0_56] : memref<2x128xf32, #tpu.memory_space<vmem>>, vector<2x64xf32>
    tpu.vector_store %arg10[%c0_55, %c0_56], %217 {strides = array<i32>} : memref<2x128xf32, #tpu.memory_space<vmem>>, vector<2x64xf32>,
    %219 = vector.extract_strided_slice %198 {offsets = [0, 256], sizes = [2, 128], strides = [1, 1]} : vector<2x384xf32> to vector<2x128xf32>
    %220 = arith.addf %219, %9 : vector<2x128xf32>
    %221 = vector.extract_strided_slice %220 {offsets = [0, 0], sizes = [2, 96], strides = [1, 1]} : vector<2x128xf32> to vector<2x96xf32>
    %222 = arith.negf %221 : vector<2x96xf32>
    %223 = math.exp %222 : vector<2x96xf32>
    %cst_57 = arith.constant 1.000000e+00 : f32
    %224 = vector.broadcast %cst_57 : f32 to vector<2x96xf32>
    %225 = arith.addf %224, %223 : vector<2x96xf32>
    %226 = arith.divf %224, %225 : vector<2x96xf32>
    %227 = vector.extract_strided_slice %226 {offsets = [0, 0], sizes = [2, 32], strides = [1, 1]} : vector<2x96xf32> to vector<2x32xf32>
    %228 = vector.extract_strided_slice %226 {offsets = [0, 32], sizes = [2, 32], strides = [1, 1]} : vector<2x96xf32> to vector<2x32xf32>
    %229 = vector.extract_strided_slice %226 {offsets = [0, 64], sizes = [2, 32], strides = [1, 1]} : vector<2x96xf32> to vector<2x32xf32>
    %230 = vector.extract_strided_slice %220 {offsets = [0, 96], sizes = [2, 32], strides = [1, 1]} : vector<2x128xf32> to vector<2x32xf32>
    %231 = math.tanh %230 : vector<2x32xf32>
    %232 = arith.mulf %228, %192 : vector<2x32xf32>
    %233 = arith.mulf %227, %231 : vector<2x32xf32>
    %234 = arith.addf %232, %233 : vector<2x32xf32>
    %235 = math.tanh %234 : vector<2x32xf32>
    %236 = arith.mulf %229, %235 : vector<2x32xf32>
    %c0_58 = arith.constant 0 : index
    %c64_59 = arith.constant 64 : index
    %237 = vector.load %arg10[%c0_58, %c64_59] : memref<2x128xf32, #tpu.memory_space<vmem>>, vector<2x32xf32>
    tpu.vector_store %arg10[%c0_58, %c64_59], %236 {strides = array<i32>} : memref<2x128xf32, #tpu.memory_space<vmem>>, vector<2x32xf32>,
    %c0_60 = arith.constant 0 : index
    %c0_61 = arith.constant 0 : index
    %238 = vector.load %arg10[%c0_60, %c0_61] : memref<2x128xf32, #tpu.memory_space<vmem>>, vector<2x128xf32>
    %239 = arith.truncf %238 : vector<2x128xf32> to vector<2x128xbf16>
    %cst_62 = arith.constant dense<0.000000e+00> : vector<2x384xf32>
    %240 = tpu.matmul %239, %6, %cst_62 {dimension_numbers = #tpu.dot_dimension_numbers<[1], [0], [0], [1], [0, 0, 1, 1], [], []>} : vector<2x128xbf16>, vector<128x384xbf16>, vector<2x384xf32> -> vector<2x384xf32>
    %241 = vector.extract_strided_slice %240 {offsets = [0, 0], sizes = [2, 256], strides = [1, 1]} : vector<2x384xf32> to vector<2x256xf32>
    %242 = vector.extract_strided_slice %5 {offsets = [12, 0], sizes = [2, 256], strides = [1, 1]} : vector<16x256xf32> to vector<2x256xf32>
    %243 = arith.addf %241, %242 : vector<2x256xf32>
    %244 = vector.extract_strided_slice %243 {offsets = [0, 0], sizes = [2, 192], strides = [1, 1]} : vector<2x256xf32> to vector<2x192xf32>
    %245 = arith.negf %244 : vector<2x192xf32>
    %246 = math.exp %245 : vector<2x192xf32>
    %cst_63 = arith.constant 1.000000e+00 : f32
    %247 = vector.broadcast %cst_63 : f32 to vector<2x192xf32>
    %248 = arith.addf %247, %246 : vector<2x192xf32>
    %249 = arith.divf %247, %248 : vector<2x192xf32>
    %250 = vector.extract_strided_slice %249 {offsets = [0, 0], sizes = [2, 64], strides = [1, 1]} : vector<2x192xf32> to vector<2x64xf32>
    %251 = vector.extract_strided_slice %249 {offsets = [0, 64], sizes = [2, 64], strides = [1, 1]} : vector<2x192xf32> to vector<2x64xf32>
    %252 = vector.extract_strided_slice %249 {offsets = [0, 128], sizes = [2, 64], strides = [1, 1]} : vector<2x192xf32> to vector<2x64xf32>
    %253 = vector.extract_strided_slice %243 {offsets = [0, 192], sizes = [2, 64], strides = [1, 1]} : vector<2x256xf32> to vector<2x64xf32>
    %254 = math.tanh %253 : vector<2x64xf32>
    %255 = arith.mulf %251, %215 : vector<2x64xf32>
    %256 = arith.mulf %250, %254 : vector<2x64xf32>
    %257 = arith.addf %255, %256 : vector<2x64xf32>
    %258 = math.tanh %257 : vector<2x64xf32>
    %259 = arith.mulf %252, %258 : vector<2x64xf32>
    %c0_64 = arith.constant 0 : index
    %c0_65 = arith.constant 0 : index
    %260 = vector.load %arg10[%c0_64, %c0_65] : memref<2x128xf32, #tpu.memory_space<vmem>>, vector<2x64xf32>
    tpu.vector_store %arg10[%c0_64, %c0_65], %259 {strides = array<i32>} : memref<2x128xf32, #tpu.memory_space<vmem>>, vector<2x64xf32>,
    %261 = vector.extract_strided_slice %240 {offsets = [0, 256], sizes = [2, 128], strides = [1, 1]} : vector<2x384xf32> to vector<2x128xf32>
    %262 = arith.addf %261, %9 : vector<2x128xf32>
    %263 = vector.extract_strided_slice %262 {offsets = [0, 0], sizes = [2, 96], strides = [1, 1]} : vector<2x128xf32> to vector<2x96xf32>
    %264 = arith.negf %263 : vector<2x96xf32>
    %265 = math.exp %264 : vector<2x96xf32>
    %cst_66 = arith.constant 1.000000e+00 : f32
    %266 = vector.broadcast %cst_66 : f32 to vector<2x96xf32>
    %267 = arith.addf %266, %265 : vector<2x96xf32>
    %268 = arith.divf %266, %267 : vector<2x96xf32>
    %269 = vector.extract_strided_slice %268 {offsets = [0, 0], sizes = [2, 32], strides = [1, 1]} : vector<2x96xf32> to vector<2x32xf32>
    %270 = vector.extract_strided_slice %268 {offsets = [0, 32], sizes = [2, 32], strides = [1, 1]} : vector<2x96xf32> to vector<2x32xf32>
    %271 = vector.extract_strided_slice %268 {offsets = [0, 64], sizes = [2, 32], strides = [1, 1]} : vector<2x96xf32> to vector<2x32xf32>
    %272 = vector.extract_strided_slice %262 {offsets = [0, 96], sizes = [2, 32], strides = [1, 1]} : vector<2x128xf32> to vector<2x32xf32>
    %273 = math.tanh %272 : vector<2x32xf32>
    %274 = arith.mulf %270, %234 : vector<2x32xf32>
    %275 = arith.mulf %269, %273 : vector<2x32xf32>
    %276 = arith.addf %274, %275 : vector<2x32xf32>
    %277 = math.tanh %276 : vector<2x32xf32>
    %278 = arith.mulf %271, %277 : vector<2x32xf32>
    %c0_67 = arith.constant 0 : index
    %c64_68 = arith.constant 64 : index
    %279 = vector.load %arg10[%c0_67, %c64_68] : memref<2x128xf32, #tpu.memory_space<vmem>>, vector<2x32xf32>
    tpu.vector_store %arg10[%c0_67, %c64_68], %278 {strides = array<i32>} : memref<2x128xf32, #tpu.memory_space<vmem>>, vector<2x32xf32>,
    %c0_69 = arith.constant 0 : index
    %c0_70 = arith.constant 0 : index
    %280 = vector.load %arg10[%c0_69, %c0_70] : memref<2x128xf32, #tpu.memory_space<vmem>>, vector<2x128xf32>
    %281 = arith.truncf %280 : vector<2x128xf32> to vector<2x128xbf16>
    %cst_71 = arith.constant dense<0.000000e+00> : vector<2x384xf32>
    %282 = tpu.matmul %281, %6, %cst_71 {dimension_numbers = #tpu.dot_dimension_numbers<[1], [0], [0], [1], [0, 0, 1, 1], [], []>} : vector<2x128xbf16>, vector<128x384xbf16>, vector<2x384xf32> -> vector<2x384xf32>
    %283 = vector.extract_strided_slice %282 {offsets = [0, 0], sizes = [2, 256], strides = [1, 1]} : vector<2x384xf32> to vector<2x256xf32>
    %284 = vector.extract_strided_slice %5 {offsets = [14, 0], sizes = [2, 256], strides = [1, 1]} : vector<16x256xf32> to vector<2x256xf32>
    %285 = arith.addf %283, %284 : vector<2x256xf32>
    %286 = vector.extract_strided_slice %285 {offsets = [0, 0], sizes = [2, 192], strides = [1, 1]} : vector<2x256xf32> to vector<2x192xf32>
    %287 = arith.negf %286 : vector<2x192xf32>
    %288 = math.exp %287 : vector<2x192xf32>
    %cst_72 = arith.constant 1.000000e+00 : f32
    %289 = vector.broadcast %cst_72 : f32 to vector<2x192xf32>
    %290 = arith.addf %289, %288 : vector<2x192xf32>
    %291 = arith.divf %289, %290 : vector<2x192xf32>
    %292 = vector.extract_strided_slice %291 {offsets = [0, 0], sizes = [2, 64], strides = [1, 1]} : vector<2x192xf32> to vector<2x64xf32>
    %293 = vector.extract_strided_slice %291 {offsets = [0, 64], sizes = [2, 64], strides = [1, 1]} : vector<2x192xf32> to vector<2x64xf32>
    %294 = vector.extract_strided_slice %291 {offsets = [0, 128], sizes = [2, 64], strides = [1, 1]} : vector<2x192xf32> to vector<2x64xf32>
    %295 = vector.extract_strided_slice %285 {offsets = [0, 192], sizes = [2, 64], strides = [1, 1]} : vector<2x256xf32> to vector<2x64xf32>
    %296 = math.tanh %295 : vector<2x64xf32>
    %297 = arith.mulf %293, %257 : vector<2x64xf32>
    %298 = arith.mulf %292, %296 : vector<2x64xf32>
    %299 = arith.addf %297, %298 : vector<2x64xf32>
    %300 = math.tanh %299 : vector<2x64xf32>
    %301 = arith.mulf %294, %300 : vector<2x64xf32>
    %c0_73 = arith.constant 0 : index
    %c0_74 = arith.constant 0 : index
    %302 = vector.load %arg10[%c0_73, %c0_74] : memref<2x128xf32, #tpu.memory_space<vmem>>, vector<2x64xf32>
    tpu.vector_store %arg10[%c0_73, %c0_74], %301 {strides = array<i32>} : memref<2x128xf32, #tpu.memory_space<vmem>>, vector<2x64xf32>,
    %303 = vector.extract_strided_slice %282 {offsets = [0, 256], sizes = [2, 128], strides = [1, 1]} : vector<2x384xf32> to vector<2x128xf32>
    %304 = arith.addf %303, %9 : vector<2x128xf32>
    %305 = vector.extract_strided_slice %304 {offsets = [0, 0], sizes = [2, 96], strides = [1, 1]} : vector<2x128xf32> to vector<2x96xf32>
    %306 = arith.negf %305 : vector<2x96xf32>
    %307 = math.exp %306 : vector<2x96xf32>
    %cst_75 = arith.constant 1.000000e+00 : f32
    %308 = vector.broadcast %cst_75 : f32 to vector<2x96xf32>
    %309 = arith.addf %308, %307 : vector<2x96xf32>
    %310 = arith.divf %308, %309 : vector<2x96xf32>
    %311 = vector.extract_strided_slice %310 {offsets = [0, 0], sizes = [2, 32], strides = [1, 1]} : vector<2x96xf32> to vector<2x32xf32>
    %312 = vector.extract_strided_slice %310 {offsets = [0, 32], sizes = [2, 32], strides = [1, 1]} : vector<2x96xf32> to vector<2x32xf32>
    %313 = vector.extract_strided_slice %310 {offsets = [0, 64], sizes = [2, 32], strides = [1, 1]} : vector<2x96xf32> to vector<2x32xf32>
    %314 = vector.extract_strided_slice %304 {offsets = [0, 96], sizes = [2, 32], strides = [1, 1]} : vector<2x128xf32> to vector<2x32xf32>
    %315 = math.tanh %314 : vector<2x32xf32>
    %316 = arith.mulf %312, %276 : vector<2x32xf32>
    %317 = arith.mulf %311, %315 : vector<2x32xf32>
    %318 = arith.addf %316, %317 : vector<2x32xf32>
    %319 = math.tanh %318 : vector<2x32xf32>
    %320 = arith.mulf %313, %319 : vector<2x32xf32>
    %c0_76 = arith.constant 0 : index
    %c64_77 = arith.constant 64 : index
    %321 = vector.load %arg10[%c0_76, %c64_77] : memref<2x128xf32, #tpu.memory_space<vmem>>, vector<2x32xf32>
    tpu.vector_store %arg10[%c0_76, %c64_77], %320 {strides = array<i32>} : memref<2x128xf32, #tpu.memory_space<vmem>>, vector<2x32xf32>,
    %c0_78 = arith.constant 0 : index
    %c0_79 = arith.constant 0 : index
    %322 = vector.load %arg10[%c0_78, %c0_79] : memref<2x128xf32, #tpu.memory_space<vmem>>, vector<2x128xf32>
    %323 = arith.truncf %322 : vector<2x128xf32> to vector<2x128xbf16>
    %cst_80 = arith.constant dense<0.000000e+00> : vector<2x384xf32>
    %324 = tpu.matmul %323, %6, %cst_80 {dimension_numbers = #tpu.dot_dimension_numbers<[1], [0], [0], [1], [0, 0, 1, 1], [], []>} : vector<2x128xbf16>, vector<128x384xbf16>, vector<2x384xf32> -> vector<2x384xf32>
    %325 = vector.extract_strided_slice %324 {offsets = [0, 256], sizes = [2, 128], strides = [1, 1]} : vector<2x384xf32> to vector<2x128xf32>
    %326 = arith.addf %325, %9 : vector<2x128xf32>
    %327 = vector.extract_strided_slice %326 {offsets = [0, 0], sizes = [2, 96], strides = [1, 1]} : vector<2x128xf32> to vector<2x96xf32>
    %328 = arith.negf %327 : vector<2x96xf32>
    %329 = math.exp %328 : vector<2x96xf32>
    %cst_81 = arith.constant 1.000000e+00 : f32
    %330 = vector.broadcast %cst_81 : f32 to vector<2x96xf32>
    %331 = arith.addf %330, %329 : vector<2x96xf32>
    %332 = arith.divf %330, %331 : vector<2x96xf32>
    %333 = vector.extract_strided_slice %332 {offsets = [0, 0], sizes = [2, 32], strides = [1, 1]} : vector<2x96xf32> to vector<2x32xf32>
    %334 = vector.extract_strided_slice %332 {offsets = [0, 32], sizes = [2, 32], strides = [1, 1]} : vector<2x96xf32> to vector<2x32xf32>
    %335 = vector.extract_strided_slice %332 {offsets = [0, 64], sizes = [2, 32], strides = [1, 1]} : vector<2x96xf32> to vector<2x32xf32>
    %336 = vector.extract_strided_slice %326 {offsets = [0, 96], sizes = [2, 32], strides = [1, 1]} : vector<2x128xf32> to vector<2x32xf32>
    %337 = math.tanh %336 : vector<2x32xf32>
    %338 = arith.mulf %334, %318 : vector<2x32xf32>
    %339 = arith.mulf %333, %337 : vector<2x32xf32>
    %340 = arith.addf %338, %339 : vector<2x32xf32>
    %341 = math.tanh %340 : vector<2x32xf32>
    %342 = arith.mulf %335, %341 : vector<2x32xf32>
    %c0_82 = arith.constant 0 : index
    %c64_83 = arith.constant 64 : index
    %343 = vector.load %arg10[%c0_82, %c64_83] : memref<2x128xf32, #tpu.memory_space<vmem>>, vector<2x32xf32>
    tpu.vector_store %arg10[%c0_82, %c64_83], %342 {strides = array<i32>} : memref<2x128xf32, #tpu.memory_space<vmem>>, vector<2x32xf32>,
    %c0_84 = arith.constant 0 : index
    %c0_85 = arith.constant 0 : index
    %344 = vector.load %arg5[%c0_84, %c0_85] : memref<32x32xf32, #tpu.memory_space<vmem>>, vector<32x32xf32>
    %cst_86 = arith.constant dense<0.000000e+00> : vector<2x32xf32>
    %345 = tpu.matmul %342, %344, %cst_86 {dimension_numbers = #tpu.dot_dimension_numbers<[1], [0], [0], [1], [0, 0, 1, 1], [], []>} : vector<2x32xf32>, vector<32x32xf32>, vector<2x32xf32> -> vector<2x32xf32>
    %c0_87 = arith.constant 0 : index
    %c0_88 = arith.constant 0 : index
    %346 = vector.load %arg6[%c0_87, %c0_88] : memref<1x32xf32, #tpu.memory_space<vmem>>, vector<1x32xf32>
    %347 = vector.broadcast %346 : vector<1x32xf32> to vector<2x32xf32>
    %348 = arith.addf %345, %347 : vector<2x32xf32>
    %cst_89 = arith.constant 0.000000e+00 : f32
    %349 = vector.broadcast %cst_89 : f32 to vector<2x32xf32>
    %350 = arith.maximumf %348, %349 : vector<2x32xf32>
    %c0_90 = arith.constant 0 : index
    %c0_91 = arith.constant 0 : index
    %351 = vector.load %arg7[%c0_90, %c0_91] : memref<32x1xf32, #tpu.memory_space<vmem>>, vector<32x1xf32>
    %cst_92 = arith.constant dense<0.000000e+00> : vector<2x1xf32>
    %352 = tpu.matmul %350, %351, %cst_92 {dimension_numbers = #tpu.dot_dimension_numbers<[1], [0], [0], [1], [0, 0, 1, 1], [], []>} : vector<2x32xf32>, vector<32x1xf32>, vector<2x1xf32> -> vector<2x1xf32>
    %c0_93 = arith.constant 0 : index
    %c0_94 = arith.constant 0 : index
    %353 = vector.load %arg8[%c0_93, %c0_94] : memref<1x1xf32, #tpu.memory_space<vmem>>, vector<1x1xf32>
    %354 = vector.broadcast %353 : vector<1x1xf32> to vector<2x1xf32>
    %355 = arith.addf %352, %354 : vector<2x1xf32>
    %c0_95 = arith.constant 0 : index
    %c0_96 = arith.constant 0 : index
    %356 = vector.load %arg9[%c0_95, %c0_96] : memref<2x1xf32, #tpu.memory_space<vmem>>, vector<2x1xf32>
    tpu.vector_store %arg9[%c0_95, %c0_96], %355 {strides = array<i32>} : memref<2x1xf32, #tpu.memory_space<vmem>>, vector<2x1xf32>,
    return
  }
}

</mosaic_0001>

<bundles_post_ra>
// kernel: lstm_model_forward.1
= control target key start
LH: loop header
LB: loop body
LE: loop exit
PB: predicated region body
PF: predicated region fallthrough
CT: control target
= control target key end

     0   :  { %s2808_s0 = inlined_call_operand.vmem [shape: f32[16,8], index: 0, kind: input, shape index: {}]   ;;  %s2809_s1 = inlined_call_operand.vmem [shape: f32[8,256], index: 1, kind: input, shape index: {}]   ;;  %s2810_s2 = inlined_call_operand.vmem [shape: f32[1,256], index: 2, kind: input, shape index: {}]   ;;  %s2811_s3 = inlined_call_operand.hbm [shape: bf16[128,384], index: 3, kind: input, shape index: {}]   ;;  %s2812_s4 = inlined_call_operand.vmem [shape: f32[1,128], index: 4, kind: input, shape index: {}]   ;;  %s2813_s5 = inlined_call_operand.vmem [shape: f32[32,32], index: 5, kind: input, shape index: {}]   ;;  %s2814_s6 = inlined_call_operand.vmem [shape: f32[1,32], index: 6, kind: input, shape index: {}]   ;;  %s2815_s7 = inlined_call_operand.vmem [shape: f32[32,1], index: 7, kind: input, shape index: {}]   ;;  %s2816_s8 = inlined_call_operand.<no memory space> [shape: f32[1,1], index: 8, kind: input, shape index: {}]   ;;  %s2817_s9 = inlined_call_operand.vmem [shape: f32[2,1], index: 9, kind: output, shape index: {}]  }
   0x1   :  { %v14_v0 = vstv %s2816_s8 }
   0x2   :  { %15 = vst [vmem:[#allocation3] sm:$0x1] %v14_v0 }
   0x3   :  { %16 = vsyncpa [#allocation5], 0  ;;  %s2194_s11 = smov [#allocation4]   ;;  %s2170_s15 = scalar_lea.hbm %s2811_s3, 3072 }
   0x4   :  { %s28_s12 = sshll.u32 %s2194_s11, 4  ;;  %p2171_p0 = scmp.ne.s32.totalorder %s2811_s3, %s2170_s15  ;;  %s29_s12 = int_to_ptr.vmem [resolvable:$true] %s28_s12 }
   0x5   :  { %p2174_p1 = scmp.lt.u32.totalorder %s2170_s15, %s2811_s3 }
   0x7   :  { %p2176_p2 = pnand %p2174_p1, %p2171_p0 }
   0x9   :  { %2179 = shalt.err (!%p2176_p2)
}
   0xa   :  { %s2180_s8 = scalar_lea.vmem %s29_s12, 3072  ;;  %p2185_p4 = scmp.lt.s32.totalorder %s29_s12, %s29_s12 }
   0xb   :  { %p2181_p3 = scmp.ne.s32.totalorder %s29_s12, %s2180_s8  ;;  %p2186_p5 = scmp.lt.s32.totalorder %s2180_s8, %s2180_s8 }
   0xd   :  { %p2187_p6 = por %p2186_p5, %p2185_p4 }
   0xf   :  { %p2188_p7 = pnand %p2187_p6, %p2181_p3 }
  0x11   :  { %2191 = shalt.err (!%p2188_p7)
}
  0x12   :  { %s2195_s20 = smov 192   ;;  %s2196_s21 = smov 12  }
  0x13   :  { %34 = dma.hbm_to_vmem [thread:$0]  %s2811_s3, 3072, %s29_s12, [#allocation5], %s2195_s20, %s2195_s20, %s2196_s21  }
  0x14   :  { %2192 = dma.done.wait [#allocation5], 3072  }
  0x15   :  { %2193 = vsyncadd [#allocation5], 4294964224  ;;  %v2197_v1 = vmov 0.0   ;;  %v52_v2 = vld [vmem:[%s2809_s1 + $0x8] sm:$0xff]  ;;  %v51_v3 = vld [vmem:[%s2809_s1] sm:$0xff]  ;;  %vm65_vm0 = vcmask 64512   ;;  %v55_v11 = vlaneseq }
  0x16   :  { %136 = vmatprep.mubr.f32.mxu0 %v2197_v1  ;;  %188 = vst [vmem:[#allocation2] sm:$0x3] %v2197_v1  ;;  %v49_v4 = vld [vmem:[%s2808_s0] sm:$0xff]  ;;  %72 = vmatprep.subr.mxu0 %v52_v2  ;;  %v2286_v7 = vld [vmem:[#allocation4 + $0x8] ss:$12 sps:$4 sm:$0xff]   ;;  %v2199_v39 = vmov 0  }
  0x17   :  { %73 = vmatpush1.msra.mxu0 %v51_v3  ;;  %v2282_v5 = vld [vmem:[#allocation4 + $0x4] ss:$12 sps:$4 sm:$0xff]   ;;  %v2284_v6 = vld [vmem:[#allocation4] ss:$12 sps:$4 sm:$0xff]   ;;  %v2288_v8 = vld [vmem:[#allocation4 + $0x1c] ss:$12 sps:$4 sm:$0xff]   ;;  %373 = vmatprep.mubr.bf16.mxu1 %v2199_v39 }
  0x18   :  { %1613 = vmatmul.mubr.msk.f32.vlgmr.msra.gmra.mrb[0].mxu0 %vm65_vm0, %v49_v4  ;;  %1750 = vmatprep.subr.bf16.mxu0 %v2197_v1  ;;  %v2292_v9 = vld [vmem:[#allocation4 + $0x20] ss:$12 sps:$4 sm:$0xff]   ;;  %v2296_v10 = vld [vmem:[#allocation4 + $0x18] ss:$12 sps:$4 sm:$0xff]   ;;  %v56_v12 = vshrl.u32 %v55_v11, 7  ;;  %vm2200_vm1 = vmmov 0  }
  0x19   :  { %142 = vmatprep.mubr.f32.mxu0 %v2197_v1  ;;  %341 = vmatprep.subr.bf16.mxu1 %v2282_v5  ;;  %v53_v14 = vld [vmem:[%s2810_s2] sm:$0x3]  ;;  %v2307_v18 = vld [vmem:[#allocation4 + $0x34] ss:$12 sps:$4 sm:$0xff]   ;;  %v2314_v21 = vld [vmem:[#allocation4 + $0x38] ss:$12 sps:$4 sm:$0xff]  }
  0x1a   :  { %1751 = vmatpush3.bf16.msra.mxu0 %v2286_v7  ;;  %342 = vmatpush1.bf16.msra.mxu1 %v2284_v6  ;;  %v61_v13 = vsub.s32 1, %v56_v12  ;;  %v2312_v20 = vld [vmem:[#allocation4 + $0x30] ss:$12 sps:$4 sm:$0xff]   ;;  %v2320_v22 = vld [vmem:[#allocation4 + $0x4c] ss:$12 sps:$4 sm:$0xff]   ;;  %s2198_s2 = smov 64  }
  0x1b   :  { %1752 = vmatprep.subr.bf16.mxu0 %v2197_v1  ;;  %343 = vmatprep.subr.bf16.mxu1 %v2288_v8  ;;  %v2323_v23 = vld [vmem:[#allocation4 + $0x48] ss:$12 sps:$4 sm:$0xff]   ;;  %v2325_v24 = vld [vmem:[#allocation4 + $0x50] ss:$12 sps:$4 sm:$0xff]   ;;  %v2333_v26 = vld [vmem:[#allocation4 + $0x60] ss:$12 sps:$4 sm:$0xff]  }
  0x1c   :  { %v2305_v15 = vrot.slane %v53_v14, %v61_v13  ;;  %v2330_v25 = vld [vmem:[#allocation4 + $0x64] ss:$12 sps:$4 sm:$0xff]   ;;  %v2335_v27 = vld [vmem:[#allocation4 + $0x68] ss:$12 sps:$4 sm:$0xff]   ;;  %v2345_v31 = vld [vmem:[#allocation4 + $0x80] ss:$12 sps:$4 sm:$0xff]  }
  0x1d   :  { %v2340_v28 = vld [vmem:[#allocation4 + $0x7c] ss:$12 sps:$4 sm:$0xff]   ;;  %v2343_v30 = vld [vmem:[#allocation4 + $0x78] ss:$12 sps:$4 sm:$0xff]   ;;  %v2351_v32 = vld [vmem:[#allocation4 + $0x94] ss:$12 sps:$4 sm:$0xff]  }
  0x1e   :  { %1753 = vmatpush3.bf16.msra.mxu0 %v2292_v9  ;;  %344 = vmatpush1.bf16.msra.mxu1 %v2296_v10  ;;  %v2354_v33 = vld [vmem:[#allocation4 + $0x90] ss:$12 sps:$4 sm:$0xff]   ;;  %v2356_v34 = vld [vmem:[#allocation4 + $0x98] ss:$12 sps:$4 sm:$0xff]   ;;  %v2367_v37 = vld [vmem:[#allocation4 + $0xa8] ss:$12 sps:$4 sm:$0xff]  }
  0x1f   :  { %1754 = vmatprep.subr.bf16.mxu0 %v2197_v1  ;;  %345 = vmatprep.subr.bf16.mxu1 %v2307_v18  ;;  %v2361_v35 = vld [vmem:[#allocation4 + $0xac] ss:$12 sps:$4 sm:$0xff]   ;;  %v2369_v38 = vld [vmem:[#allocation4 + $0xb0] ss:$12 sps:$4 sm:$0xff]   ;;  %v57_v40 = vsub.s32 0, %v56_v12  ;;  %vm209_vm2 = vcmask 517120  }
  0x20   :  { %v50_v36 = vld [vmem:[%s2808_s0 + $0x8] sm:$0xff]  ;;  %v2433_v59 = vld [vmem:[%s2812_s4] ss:$0 sm:$0xff]  ;;  %s2201_s12 = smov 32   ;;  %vm490_vm3 = vcmask 779776   ;;  %vm1448_vm4 = vcmask 261120  }
  0x21   :  { %1614 = vmatmul.mubr.msk.f32.gmra.mrb[2].mxu0 %vm65_vm0, %v50_v36  ;;  %v2380_v41 = vrot.slane %v53_v14, %v57_v40  ;;  %vm1606_vm5 = vcmask 1024  }
  0x22   :  { %346 = vmatpush1.bf16.msra.mxu1 %v2312_v20  ;;  %1755 = vmatpush3.bf16.msra.mxu0 %v2314_v21 }
  0x23   :  { %1756 = vmatprep.subr.bf16.mxu0 %v2197_v1  ;;  %347 = vmatprep.subr.bf16.mxu1 %v2320_v22 }
  0x24   :  { %1766 = vmatprep.mubr.msk.bf16.mxu0 %vm2200_vm1, %v2197_v1 }
  0x26   :  { %348 = vmatpush1.bf16.msra.mxu1 %v2323_v23  ;;  %1757 = vmatpush3.bf16.msra.mxu0 %v2325_v24 }
  0x27   :  { %1758 = vmatprep.subr.bf16.mxu0 %v2197_v1  ;;  %349 = vmatprep.subr.bf16.mxu1 %v2330_v25 }
  0x2a   :  { %350 = vmatpush1.bf16.msra.mxu1 %v2333_v26  ;;  %1759 = vmatpush3.bf16.msra.mxu0 %v2335_v27 }
  0x2b   :  { %1760 = vmatprep.subr.bf16.mxu0 %v2197_v1  ;;  %351 = vmatprep.subr.bf16.mxu1 %v2340_v28 }
  0x2e   :  { %352 = vmatpush1.bf16.msra.mxu1 %v2343_v30  ;;  %1761 = vmatpush3.bf16.msra.mxu0 %v2345_v31 }
  0x2f   :  { %1762 = vmatprep.subr.bf16.mxu0 %v2197_v1  ;;  %353 = vmatprep.subr.bf16.mxu1 %v2351_v32 }
  0x32   :  { %354 = vmatpush1.bf16.msra.mxu1 %v2354_v33  ;;  %1763 = vmatpush3.bf16.msra.mxu0 %v2356_v34 }
  0x33   :  { %1764 = vmatprep.subr.bf16.mxu0 %v2197_v1  ;;  %355 = vmatprep.subr.bf16.mxu1 %v2361_v35 }
  0x36   :  { %356 = vmatpush1.bf16.msra.mxu1 %v2367_v37  ;;  %1765 = vmatpush3.bf16.msra.mxu0 %v2369_v38 }
  0x37   :  { %494 = vmatprep.subr.bf16.mxu1 %v2282_v5  ;;  %1770 = vmatprep.subr.bf16.mxu0 %v2197_v1 }
  0xeb   :  { %v138_v16 = vpop.f32.mrb[0].mxu0 }
  0xec   :  { %v140_v17 = vpop.f32.mrb[1].mxu0  ;;  %v2383_v42 = vadd.f32 %v138_v16, %v2380_v41 }
  0xed   :  { %v2310_v19 = vadd.f32 %v140_v17, %v2305_v15 }
  0xee   :  { %v1616_v43 = vmul.f32 -1.442695, %v2383_v42  ;;  %v424_v60 = vrot.slane %v2383_v42, 2 }
  0xef   :  { %1985 = vtanh.f32 %v2310_v19  ;;  %v1617_v44 = vmul.f32 -1.442695, %v2310_v19  ;;  %v425_v63 = vrot.slane %v2310_v19, 2 }
  0xf0   :  { %1987 = vpow2.f32 %v1616_v43 }
  0xf1   :  { %1989 = vpow2.f32 %v1617_v44 }
  0xf4   :  { %v2426_v57 = vpop.f32.mrb[2].mxu0 }
  0xf5   :  { %v2428_v58 = vpop.f32.mrb[3].mxu0 }
  0xf9   :  { %v1986_v29 = vpop.eup %1985 }
  0xfa   :  { %203 = vrot.lane.b32.xlu0 %v1986_v29, %s2198_s2  ;;  %v1988_v45 = vpop.eup %1987 }
  0xfb   :  { %v195_v46 = vadd.f32 1.0, %v1988_v45  ;;  %v1990_v47 = vpop.eup %1989 }
  0xfc   :  { %v196_v48 = vadd.f32 1.0, %v1990_v47 }
  0xfd   :  { %1991 = vrcp.f32 %v195_v46 }
  0xfe   :  { %1993 = vrcp.f32 %v196_v48 }
 0x107   :  { %v1992_v49 = vpop.eup %1991 }
 0x108   :  { %v1994_v52 = vpop.eup %1993 }
 0x16c   :  { %v204_v50 = vpop.permute.xlu0 %203 }
 0x16d   :  { %v2387_v51 = vmul.f32 %v1992_v49, %v204_v50 }
 0x16f   :  { %1995 = vtanh.f32 %v2387_v51 }
 0x179   :  { %v1996_v53 = vpop.eup %1995 }
 0x17a   :  { %v208_v54 = vmul.f32 %v1996_v53, %v1994_v52 }
 0x17c   :  { %210 = vst.msk [vmem:[#allocation2] sm:$0x3] %vm209_vm2, %v208_v54 }
 0x183   :  { %v211_v55 = vld [vmem:[#allocation2] sm:$0x3] }
 0x184   :  { %v212_v56 = vpack.c.bf16 %v211_v55, %v211_v55 }
 0x186   :  { %374 = vmatmul.mubr.bf16.vlgmr.msra.gmra.mrb[0].mxu1 %v212_v56  ;;  %1767 = vmatmul.mubr.bf16.vlgmr.msra.gmra.mrb[4].mxu0 %v212_v56 }
 0x187   :  { %495 = vmatpush1.bf16.msra.mxu1 %v2284_v6  ;;  %1771 = vmatpush3.bf16.msra.mxu0 %v2286_v7 }
 0x188   :  { %496 = vmatprep.subr.bf16.mxu1 %v2288_v8  ;;  %1772 = vmatprep.subr.bf16.mxu0 %v2197_v1 }
 0x189   :  { %526 = vmatprep.mubr.bf16.mxu1 %v2199_v39  ;;  %1786 = vmatprep.mubr.msk.bf16.mxu0 %vm2200_vm1, %v2197_v1 }
 0x18b   :  { %497 = vmatpush1.bf16.msra.mxu1 %v2296_v10  ;;  %1773 = vmatpush3.bf16.msra.mxu0 %v2292_v9 }
 0x18c   :  { %498 = vmatprep.subr.bf16.mxu1 %v2307_v18  ;;  %1774 = vmatprep.subr.bf16.mxu0 %v2197_v1 }
 0x18f   :  { %499 = vmatpush1.bf16.msra.mxu1 %v2312_v20  ;;  %1775 = vmatpush3.bf16.msra.mxu0 %v2314_v21 }
 0x190   :  { %500 = vmatprep.subr.bf16.mxu1 %v2320_v22  ;;  %1776 = vmatprep.subr.bf16.mxu0 %v2197_v1 }
 0x193   :  { %501 = vmatpush1.bf16.msra.mxu1 %v2323_v23  ;;  %1777 = vmatpush3.bf16.msra.mxu0 %v2325_v24 }
 0x194   :  { %502 = vmatprep.subr.bf16.mxu1 %v2330_v25  ;;  %1778 = vmatprep.subr.bf16.mxu0 %v2197_v1 }
 0x197   :  { %1779 = vmatpush3.bf16.msra.mxu0 %v2335_v27  ;;  %503 = vmatpush1.bf16.msra.mxu1 %v2333_v26 }
 0x198   :  { %504 = vmatprep.subr.bf16.mxu1 %v2340_v28  ;;  %1780 = vmatprep.subr.bf16.mxu0 %v2197_v1 }
 0x19b   :  { %505 = vmatpush1.bf16.msra.mxu1 %v2343_v30  ;;  %1781 = vmatpush3.bf16.msra.mxu0 %v2345_v31 }
 0x19c   :  { %506 = vmatprep.subr.bf16.mxu1 %v2351_v32  ;;  %1782 = vmatprep.subr.bf16.mxu0 %v2197_v1 }
 0x19f   :  { %507 = vmatpush1.bf16.msra.mxu1 %v2354_v33  ;;  %1783 = vmatpush3.bf16.msra.mxu0 %v2356_v34 }
 0x1a0   :  { %508 = vmatprep.subr.bf16.mxu1 %v2361_v35  ;;  %1784 = vmatprep.subr.bf16.mxu0 %v2197_v1 }
 0x1a3   :  { %509 = vmatpush1.bf16.msra.mxu1 %v2367_v37  ;;  %1785 = vmatpush3.bf16.msra.mxu0 %v2369_v38 }
 0x1a4   :  { %640 = vmatprep.subr.bf16.mxu1 %v2282_v5  ;;  %1790 = vmatprep.subr.bf16.mxu0 %v2197_v1 }
 0x259   :  { %v375_v61 = vpop.f32.mrb[0].mxu1  ;;  %v416_v62 = vpop.f32.mrb[4].mxu0 }
 0x25a   :  { %v428_v0 = vadd.f32 %v424_v60, %v375_v61  ;;  %v465_v2 = vadd.f32 %v2433_v59, %v416_v62  ;;  %v377_v3 = vpop.f32.mrb[1].mxu1  ;;  %v1768_v4 = vpop.f32.mrb[5].mxu0 }
 0x25b   :  { %v429_v11 = vadd.f32 %v425_v63, %v377_v3  ;;  %v379_v12 = vpop.f32.mrb[2].mxu1  ;;  %v419_v13 = vpop.f32.mrb[6].mxu0 }
 0x25c   :  { %1997 = vtanh.f32 %v465_v2  ;;  %v380_v14 = vpop.f32.mrb[3].mxu1  ;;  %v1769_v16 = vpop.f32.mrb[7].mxu0  ;;  %v1644_v36 = vmul.f32 -1.442695, %v465_v2  ;;  %v1642_v40 = vmul.f32 -1.442695, %v428_v0 }
 0x25d   :  { %1999 = vtanh.f32 %v429_v11  ;;  %v1643_v2 = vmul.f32 -1.442695, %v429_v11  ;;  %v575_v11 = vrot.slane %v2383_v42, 4 }
 0x25e   :  { %2001 = vpow2.f32 %v1644_v36 }
 0x25f   :  { %2003 = vpow2.f32 %v1642_v40 }
 0x266   :  { %v1998_v17 = vpop.eup %1997 }
 0x267   :  { %v2000_v29 = vpop.eup %1999  ;;  %475 = vrot.lane.b32.xlu1 %v1998_v17, %s2201_s12 }
 0x268   :  { %449 = vrot.lane.b32.xlu0 %v2000_v29, %s2198_s2  ;;  %v2002_v43 = vpop.eup %2001 }
 0x269   :  { %v2004_v44 = vpop.eup %2003  ;;  %v469_v45 = vadd.f32 1.0, %v2002_v43 }
 0x26a   :  { %v436_v46 = vadd.f32 1.0, %v2004_v44  ;;  %v576_v44 = vrot.slane %v2310_v19, 4 }
 0x26b   :  { %444 = vrot.lane.b32.xlu1 %v2387_v51, %s2198_s2  ;;  %2005 = vrcp.f32 %v469_v45 }
 0x26c   :  { %2007 = vrcp.f32 %v436_v46 }
 0x275   :  { %v2006_v47 = vpop.eup %2005 }
 0x276   :  { %v2008_v49 = vpop.eup %2007  ;;  %v473_v54 = vmul.f32 0.0, %v2006_v47 }
 0x2d9   :  { %v476_v48 = vpop.permute.xlu1 %475 }
 0x2da   :  { %v478_v50 = vmul.f32 %v2006_v47, %v476_v48  ;;  %v450_v52 = vpop.permute.xlu0 %449 }
 0x2db   :  { %v452_v53 = vmul.f32 %v2008_v49, %v450_v52 }
 0x2dc   :  { %480 = vrot.lane.b32.xlu1 %v478_v50, %s2201_s12 }
 0x2dd   :  { %454 = vrot.lane.b32.xlu0 %v452_v53, %s2198_s2  ;;  %v445_v51 = vpop.permute.xlu1 %444 }
 0x2de   :  { %v447_v55 = vmul.f32 %v2008_v49, %v445_v51 }
 0x34e   :  { %v481_v56 = vpop.permute.xlu1 %480 }
 0x34f   :  { %v2444_v60 = vadd.f32 %v481_v56, %v473_v54  ;;  %v455_v61 = vpop.permute.xlu0 %454 }
 0x350   :  { %v2446_v62 = vadd.f32 %v455_v61, %v447_v55 }
 0x351   :  { %2009 = vtanh.f32 %v2444_v60 }
 0x352   :  { %2011 = vtanh.f32 %v2446_v62 }
 0x353   :  { %2013 = vpow2.f32 %v1643_v2 }
 0x35b   :  { %v2010_v63 = vpop.eup %2009 }
 0x35c   :  { %v2012_v0 = vpop.eup %2011  ;;  %486 = vrot.lane.b32.xlu1 %v2010_v63, %s2201_s12 }
 0x35d   :  { %460 = vrot.lane.b32.xlu0 %v2012_v0, %s2198_s2  ;;  %v2014_v3 = vpop.eup %2013 }
 0x35e   :  { %v437_v4 = vadd.f32 1.0, %v2014_v3 }
 0x360   :  { %2015 = vrcp.f32 %v437_v4 }
 0x36a   :  { %v2016_v13 = vpop.eup %2015 }
 0x3ce   :  { %v487_v12 = vpop.permute.xlu1 %486 }
 0x3cf   :  { %v461_v14 = vpop.permute.xlu0 %460  ;;  %v489_v17 = vmul.f32 %v2006_v47, %v487_v12 }
 0x3d0   :  { %v463_v16 = vmul.f32 %v2016_v13, %v461_v14 }
 0x3d2   :  { %464 = vst.msk [vmem:[#allocation2] sm:$0x3] %vm209_vm2, %v463_v16 }
 0x3d3   :  { %491 = vst.msk [vmem:[#allocation2] sm:$0x3] %vm490_vm3, %v489_v17 }
 0x3da   :  { %v492_v29 = vld [vmem:[#allocation2] sm:$0x3] }
 0x3db   :  { %v493_v36 = vpack.c.bf16 %v492_v29, %v492_v29 }
 0x3dd   :  { %527 = vmatmul.mubr.bf16.vlgmr.msra.gmra.mrb[4].mxu1 %v493_v36  ;;  %1787 = vmatmul.mubr.bf16.vlgmr.msra.gmra.mrb[8].mxu0 %v493_v36 }
 0x3de   :  { %641 = vmatpush1.bf16.msra.mxu1 %v2284_v6  ;;  %1791 = vmatpush3.bf16.msra.mxu0 %v2286_v7 }
 0x3df   :  { %642 = vmatprep.subr.bf16.mxu1 %v2288_v8  ;;  %1792 = vmatprep.subr.bf16.mxu0 %v2197_v1 }
 0x3e0   :  { %672 = vmatprep.mubr.bf16.mxu1 %v2199_v39  ;;  %1806 = vmatprep.mubr.msk.bf16.mxu0 %vm2200_vm1, %v2197_v1 }
 0x3e2   :  { %643 = vmatpush1.bf16.msra.mxu1 %v2296_v10  ;;  %1793 = vmatpush3.bf16.msra.mxu0 %v2292_v9 }
 0x3e3   :  { %644 = vmatprep.subr.bf16.mxu1 %v2307_v18  ;;  %1794 = vmatprep.subr.bf16.mxu0 %v2197_v1 }
 0x3e6   :  { %645 = vmatpush1.bf16.msra.mxu1 %v2312_v20  ;;  %1795 = vmatpush3.bf16.msra.mxu0 %v2314_v21 }
 0x3e7   :  { %646 = vmatprep.subr.bf16.mxu1 %v2320_v22  ;;  %1796 = vmatprep.subr.bf16.mxu0 %v2197_v1 }
 0x3ea   :  { %647 = vmatpush1.bf16.msra.mxu1 %v2323_v23  ;;  %1797 = vmatpush3.bf16.msra.mxu0 %v2325_v24 }
 0x3eb   :  { %648 = vmatprep.subr.bf16.mxu1 %v2330_v25  ;;  %1798 = vmatprep.subr.bf16.mxu0 %v2197_v1 }
 0x3ee   :  { %1799 = vmatpush3.bf16.msra.mxu0 %v2335_v27  ;;  %649 = vmatpush1.bf16.msra.mxu1 %v2333_v26 }
 0x3ef   :  { %650 = vmatprep.subr.bf16.mxu1 %v2340_v28  ;;  %1800 = vmatprep.subr.bf16.mxu0 %v2197_v1 }
 0x3f2   :  { %651 = vmatpush1.bf16.msra.mxu1 %v2343_v30  ;;  %1801 = vmatpush3.bf16.msra.mxu0 %v2345_v31 }
 0x3f3   :  { %652 = vmatprep.subr.bf16.mxu1 %v2351_v32  ;;  %1802 = vmatprep.subr.bf16.mxu0 %v2197_v1 }
 0x3f6   :  { %653 = vmatpush1.bf16.msra.mxu1 %v2354_v33  ;;  %1803 = vmatpush3.bf16.msra.mxu0 %v2356_v34 }
 0x3f7   :  { %654 = vmatprep.subr.bf16.mxu1 %v2361_v35  ;;  %1804 = vmatprep.subr.bf16.mxu0 %v2197_v1 }
 0x3fa   :  { %655 = vmatpush1.bf16.msra.mxu1 %v2367_v37  ;;  %1805 = vmatpush3.bf16.msra.mxu0 %v2369_v38 }
 0x3fb   :  { %786 = vmatprep.subr.bf16.mxu1 %v2282_v5  ;;  %1810 = vmatprep.subr.bf16.mxu0 %v2197_v1 }
 0x4b0   :  { %v528_v40 = vpop.f32.mrb[4].mxu1  ;;  %v569_v43 = vpop.f32.mrb[8].mxu0 }
 0x4b1   :  { %v579_v45 = vadd.f32 %v575_v11, %v528_v40  ;;  %v612_v46 = vadd.f32 %v2433_v59, %v569_v43  ;;  %v530_v47 = vpop.f32.mrb[5].mxu1  ;;  %v1788_v48 = vpop.f32.mrb[9].mxu0 }
 0x4b2   :  { %v580_v49 = vadd.f32 %v576_v44, %v530_v47  ;;  %v532_v50 = vpop.f32.mrb[6].mxu1  ;;  %v572_v52 = vpop.f32.mrb[10].mxu0 }
 0x4b3   :  { %2017 = vtanh.f32 %v612_v46  ;;  %v533_v53 = vpop.f32.mrb[7].mxu1  ;;  %v1789_v51 = vpop.f32.mrb[11].mxu0  ;;  %v1647_v56 = vmul.f32 -1.442695, %v612_v46  ;;  %v1645_v61 = vmul.f32 -1.442695, %v579_v45 }
 0x4b4   :  { %2019 = vtanh.f32 %v580_v49  ;;  %v1646_v47 = vmul.f32 -1.442695, %v580_v49  ;;  %v721_v49 = vrot.slane %v2383_v42, 6 }
 0x4b5   :  { %2021 = vpow2.f32 %v1647_v56 }
 0x4b6   :  { %2023 = vpow2.f32 %v1645_v61 }
 0x4bd   :  { %v2018_v54 = vpop.eup %2017 }
 0x4be   :  { %v2020_v55 = vpop.eup %2019  ;;  %622 = vrot.lane.b32.xlu1 %v2018_v54, %s2201_s12 }
 0x4bf   :  { %596 = vrot.lane.b32.xlu0 %v2020_v55, %s2198_s2  ;;  %v2022_v63 = vpop.eup %2021 }
 0x4c0   :  { %v2024_v0 = vpop.eup %2023  ;;  %v616_v2 = vadd.f32 1.0, %v2022_v63  ;;  %v722_v63 = vrot.slane %v2310_v19, 6 }
 0x4c1   :  { %v587_v3 = vadd.f32 1.0, %v2024_v0 }
 0x4c2   :  { %2025 = vrcp.f32 %v616_v2 }
 0x4c3   :  { %2027 = vrcp.f32 %v587_v3 }
 0x4cc   :  { %v2026_v4 = vpop.eup %2025 }
 0x4cd   :  { %v2028_v13 = vpop.eup %2027  ;;  %v620_v29 = vmul.f32 %v2026_v4, %v2444_v60 }
 0x4ce   :  { %v594_v11 = vmul.f32 %v2028_v13, %v2446_v62 }
 0x530   :  { %v623_v12 = vpop.permute.xlu1 %622 }
 0x531   :  { %v625_v14 = vmul.f32 %v2026_v4, %v623_v12  ;;  %v597_v16 = vpop.permute.xlu0 %596 }
 0x532   :  { %v599_v17 = vmul.f32 %v2028_v13, %v597_v16 }
 0x533   :  { %627 = vrot.lane.b32.xlu1 %v625_v14, %s2201_s12 }
 0x534   :  { %601 = vrot.lane.b32.xlu0 %v599_v17, %s2198_s2 }
 0x5a5   :  { %v628_v36 = vpop.permute.xlu1 %627 }
 0x5a6   :  { %v2498_v40 = vadd.f32 %v628_v36, %v620_v29  ;;  %v602_v43 = vpop.permute.xlu0 %601 }
 0x5a7   :  { %v2500_v44 = vadd.f32 %v602_v43, %v594_v11 }
 0x5a8   :  { %2029 = vtanh.f32 %v2498_v40 }
 0x5a9   :  { %2031 = vtanh.f32 %v2500_v44 }
 0x5aa   :  { %2033 = vpow2.f32 %v1646_v47 }
 0x5b2   :  { %v2030_v45 = vpop.eup %2029 }
 0x5b3   :  { %v2032_v46 = vpop.eup %2031  ;;  %633 = vrot.lane.b32.xlu1 %v2030_v45, %s2201_s12 }
 0x5b4   :  { %607 = vrot.lane.b32.xlu0 %v2032_v46, %s2198_s2  ;;  %v2034_v60 = vpop.eup %2033 }
 0x5b5   :  { %v588_v48 = vadd.f32 1.0, %v2034_v60 }
 0x5b7   :  { %2035 = vrcp.f32 %v588_v48 }
 0x5c1   :  { %v2036_v50 = vpop.eup %2035 }
 0x625   :  { %v634_v62 = vpop.permute.xlu1 %633 }
 0x626   :  { %v608_v52 = vpop.permute.xlu0 %607  ;;  %v636_v51 = vmul.f32 %v2026_v4, %v634_v62 }
 0x627   :  { %v610_v53 = vmul.f32 %v2036_v50, %v608_v52 }
 0x629   :  { %611 = vst.msk [vmem:[#allocation2] sm:$0x3] %vm209_vm2, %v610_v53 }
 0x62a   :  { %637 = vst.msk [vmem:[#allocation2] sm:$0x3] %vm490_vm3, %v636_v51 }
 0x631   :  { %v638_v54 = vld [vmem:[#allocation2] sm:$0x3] }
 0x632   :  { %v639_v55 = vpack.c.bf16 %v638_v54, %v638_v54 }
 0x634   :  { %673 = vmatmul.mubr.bf16.vlgmr.msra.gmra.mrb[8].mxu1 %v639_v55  ;;  %1807 = vmatmul.mubr.bf16.vlgmr.msra.gmra.mrb[12].mxu0 %v639_v55 }
 0x635   :  { %787 = vmatpush1.bf16.msra.mxu1 %v2284_v6  ;;  %1811 = vmatpush3.bf16.msra.mxu0 %v2286_v7 }
 0x636   :  { %788 = vmatprep.subr.bf16.mxu1 %v2288_v8  ;;  %1812 = vmatprep.subr.bf16.mxu0 %v2197_v1 }
 0x637   :  { %818 = vmatprep.mubr.bf16.mxu1 %v2199_v39  ;;  %1826 = vmatprep.mubr.msk.bf16.mxu0 %vm2200_vm1, %v2197_v1 }
 0x639   :  { %789 = vmatpush1.bf16.msra.mxu1 %v2296_v10  ;;  %1813 = vmatpush3.bf16.msra.mxu0 %v2292_v9 }
 0x63a   :  { %790 = vmatprep.subr.bf16.mxu1 %v2307_v18  ;;  %1814 = vmatprep.subr.bf16.mxu0 %v2197_v1 }
 0x63d   :  { %791 = vmatpush1.bf16.msra.mxu1 %v2312_v20  ;;  %1815 = vmatpush3.bf16.msra.mxu0 %v2314_v21 }
 0x63e   :  { %792 = vmatprep.subr.bf16.mxu1 %v2320_v22  ;;  %1816 = vmatprep.subr.bf16.mxu0 %v2197_v1 }
 0x641   :  { %793 = vmatpush1.bf16.msra.mxu1 %v2323_v23  ;;  %1817 = vmatpush3.bf16.msra.mxu0 %v2325_v24 }
 0x642   :  { %794 = vmatprep.subr.bf16.mxu1 %v2330_v25  ;;  %1818 = vmatprep.subr.bf16.mxu0 %v2197_v1 }
 0x645   :  { %1819 = vmatpush3.bf16.msra.mxu0 %v2335_v27  ;;  %795 = vmatpush1.bf16.msra.mxu1 %v2333_v26 }
 0x646   :  { %796 = vmatprep.subr.bf16.mxu1 %v2340_v28  ;;  %1820 = vmatprep.subr.bf16.mxu0 %v2197_v1 }
 0x649   :  { %797 = vmatpush1.bf16.msra.mxu1 %v2343_v30  ;;  %1821 = vmatpush3.bf16.msra.mxu0 %v2345_v31 }
 0x64a   :  { %798 = vmatprep.subr.bf16.mxu1 %v2351_v32  ;;  %1822 = vmatprep.subr.bf16.mxu0 %v2197_v1 }
 0x64d   :  { %799 = vmatpush1.bf16.msra.mxu1 %v2354_v33  ;;  %1823 = vmatpush3.bf16.msra.mxu0 %v2356_v34 }
 0x64e   :  { %800 = vmatprep.subr.bf16.mxu1 %v2361_v35  ;;  %1824 = vmatprep.subr.bf16.mxu0 %v2197_v1 }
 0x651   :  { %801 = vmatpush1.bf16.msra.mxu1 %v2367_v37  ;;  %1825 = vmatpush3.bf16.msra.mxu0 %v2369_v38 }
 0x652   :  { %928 = vmatprep.subr.bf16.mxu1 %v2282_v5  ;;  %1830 = vmatprep.subr.bf16.mxu0 %v2197_v1 }
 0x707   :  { %v674_v56 = vpop.f32.mrb[8].mxu1  ;;  %v715_v61 = vpop.f32.mrb[12].mxu0 }
 0x708   :  { %v725_v0 = vadd.f32 %v721_v49, %v674_v56  ;;  %v758_v2 = vadd.f32 %v2433_v59, %v715_v61  ;;  %v676_v3 = vpop.f32.mrb[9].mxu1  ;;  %v1808_v4 = vpop.f32.mrb[13].mxu0 }
 0x709   :  { %v726_v12 = vadd.f32 %v722_v63, %v676_v3  ;;  %v678_v13 = vpop.f32.mrb[10].mxu1  ;;  %v718_v14 = vpop.f32.mrb[14].mxu0 }
 0x70a   :  { %2037 = vtanh.f32 %v758_v2  ;;  %v679_v16 = vpop.f32.mrb[11].mxu1  ;;  %v1809_v17 = vpop.f32.mrb[15].mxu0  ;;  %v1650_v42 = vmul.f32 -1.442695, %v758_v2  ;;  %v1648_v19 = vmul.f32 -1.442695, %v725_v0 }
 0x70b   :  { %2039 = vtanh.f32 %v726_v12  ;;  %v1649_v0 = vmul.f32 -1.442695, %v726_v12  ;;  %v2599_v12 = vadd.f32 %v2428_v58, %v2305_v15  ;;  %v2607_v15 = vadd.f32 %v2426_v57, %v2380_v41 }
 0x70c   :  { %2041 = vpow2.f32 %v1650_v42 }
 0x70d   :  { %2043 = vpow2.f32 %v1648_v19 }
 0x714   :  { %v2038_v29 = vpop.eup %2037 }
 0x715   :  { %v2040_v36 = vpop.eup %2039  ;;  %768 = vrot.lane.b32.xlu1 %v2038_v29, %s2201_s12 }
 0x716   :  { %742 = vrot.lane.b32.xlu0 %v2040_v36, %s2198_s2  ;;  %v2042_v11 = vpop.eup %2041 }
 0x717   :  { %v2044_v43 = vpop.eup %2043  ;;  %v762_v45 = vadd.f32 1.0, %v2042_v11 }
 0x718   :  { %v733_v46 = vadd.f32 1.0, %v2044_v43 }
 0x719   :  { %2045 = vrcp.f32 %v762_v45 }
 0x71a   :  { %2047 = vrcp.f32 %v733_v46 }
 0x723   :  { %v2046_v47 = vpop.eup %2045 }
 0x724   :  { %v2048_v48 = vpop.eup %2047  ;;  %v766_v53 = vmul.f32 %v2046_v47, %v2498_v40 }
 0x725   :  { %v740_v54 = vmul.f32 %v2048_v48, %v2500_v44 }
 0x787   :  { %v769_v60 = vpop.permute.xlu1 %768 }
 0x788   :  { %v771_v62 = vmul.f32 %v2046_v47, %v769_v60  ;;  %v743_v50 = vpop.permute.xlu0 %742 }
 0x789   :  { %v745_v52 = vmul.f32 %v2048_v48, %v743_v50 }
 0x78a   :  { %773 = vrot.lane.b32.xlu1 %v771_v62, %s2201_s12 }
 0x78b   :  { %747 = vrot.lane.b32.xlu0 %v745_v52, %s2198_s2 }
 0x7fc   :  { %v774_v51 = vpop.permute.xlu1 %773 }
 0x7fd   :  { %v2552_v55 = vadd.f32 %v774_v51, %v766_v53  ;;  %v748_v49 = vpop.permute.xlu0 %747 }
 0x7fe   :  { %v2554_v56 = vadd.f32 %v748_v49, %v740_v54 }
 0x7ff   :  { %2049 = vtanh.f32 %v2552_v55 }
 0x800   :  { %2051 = vtanh.f32 %v2554_v56 }
 0x801   :  { %2053 = vpow2.f32 %v1649_v0 }
 0x809   :  { %v2050_v61 = vpop.eup %2049 }
 0x80a   :  { %v2052_v63 = vpop.eup %2051  ;;  %779 = vrot.lane.b32.xlu1 %v2050_v61, %s2201_s12 }
 0x80b   :  { %753 = vrot.lane.b32.xlu0 %v2052_v63, %s2198_s2  ;;  %v2054_v40 = vpop.eup %2053 }
 0x80c   :  { %v734_v2 = vadd.f32 1.0, %v2054_v40 }
 0x80e   :  { %2055 = vrcp.f32 %v734_v2 }
 0x818   :  { %v2056_v3 = vpop.eup %2055 }
 0x87c   :  { %v780_v44 = vpop.permute.xlu1 %779 }
 0x87d   :  { %v754_v4 = vpop.permute.xlu0 %753  ;;  %v782_v14 = vmul.f32 %v2046_v47, %v780_v44 }
 0x87e   :  { %v756_v13 = vmul.f32 %v2056_v3, %v754_v4 }
 0x880   :  { %757 = vst.msk [vmem:[#allocation2] sm:$0x3] %vm209_vm2, %v756_v13 }
 0x881   :  { %783 = vst.msk [vmem:[#allocation2] sm:$0x3] %vm490_vm3, %v782_v14 }
 0x888   :  { %v784_v16 = vld [vmem:[#allocation2] sm:$0x3] }
 0x889   :  { %v785_v17 = vpack.c.bf16 %v784_v16, %v784_v16 }
 0x88b   :  { %819 = vmatmul.mubr.bf16.vlgmr.msra.gmra.mrb[12].mxu1 %v785_v17  ;;  %1827 = vmatmul.mubr.bf16.vlgmr.msra.gmra.mrb[16].mxu0 %v785_v17 }
 0x88c   :  { %929 = vmatpush1.bf16.msra.mxu1 %v2284_v6  ;;  %1831 = vmatpush3.bf16.msra.mxu0 %v2286_v7 }
 0x88d   :  { %930 = vmatprep.subr.bf16.mxu1 %v2288_v8  ;;  %1832 = vmatprep.subr.bf16.mxu0 %v2197_v1 }
 0x88e   :  { %960 = vmatprep.mubr.bf16.mxu1 %v2199_v39  ;;  %1846 = vmatprep.mubr.msk.bf16.mxu0 %vm2200_vm1, %v2197_v1 }
 0x890   :  { %931 = vmatpush1.bf16.msra.mxu1 %v2296_v10  ;;  %1833 = vmatpush3.bf16.msra.mxu0 %v2292_v9 }
 0x891   :  { %932 = vmatprep.subr.bf16.mxu1 %v2307_v18  ;;  %1834 = vmatprep.subr.bf16.mxu0 %v2197_v1 }
 0x894   :  { %933 = vmatpush1.bf16.msra.mxu1 %v2312_v20  ;;  %1835 = vmatpush3.bf16.msra.mxu0 %v2314_v21 }
 0x895   :  { %934 = vmatprep.subr.bf16.mxu1 %v2320_v22  ;;  %1836 = vmatprep.subr.bf16.mxu0 %v2197_v1 }
 0x898   :  { %935 = vmatpush1.bf16.msra.mxu1 %v2323_v23  ;;  %1837 = vmatpush3.bf16.msra.mxu0 %v2325_v24 }
 0x899   :  { %936 = vmatprep.subr.bf16.mxu1 %v2330_v25  ;;  %1838 = vmatprep.subr.bf16.mxu0 %v2197_v1 }
 0x89c   :  { %1839 = vmatpush3.bf16.msra.mxu0 %v2335_v27  ;;  %937 = vmatpush1.bf16.msra.mxu1 %v2333_v26 }
 0x89d   :  { %938 = vmatprep.subr.bf16.mxu1 %v2340_v28  ;;  %1840 = vmatprep.subr.bf16.mxu0 %v2197_v1 }
 0x8a0   :  { %939 = vmatpush1.bf16.msra.mxu1 %v2343_v30  ;;  %1841 = vmatpush3.bf16.msra.mxu0 %v2345_v31 }
 0x8a1   :  { %940 = vmatprep.subr.bf16.mxu1 %v2351_v32  ;;  %1842 = vmatprep.subr.bf16.mxu0 %v2197_v1 }
 0x8a4   :  { %941 = vmatpush1.bf16.msra.mxu1 %v2354_v33  ;;  %1843 = vmatpush3.bf16.msra.mxu0 %v2356_v34 }
 0x8a5   :  { %942 = vmatprep.subr.bf16.mxu1 %v2361_v35  ;;  %1844 = vmatprep.subr.bf16.mxu0 %v2197_v1 }
 0x8a8   :  { %943 = vmatpush1.bf16.msra.mxu1 %v2367_v37  ;;  %1845 = vmatpush3.bf16.msra.mxu0 %v2369_v38 }
 0x8a9   :  { %1076 = vmatprep.subr.bf16.mxu1 %v2282_v5  ;;  %1850 = vmatprep.subr.bf16.mxu0 %v2197_v1 }
 0x95e   :  { %v820_v29 = vpop.f32.mrb[12].mxu1  ;;  %v861_v36 = vpop.f32.mrb[16].mxu0 }
 0x95f   :  { %v900_v42 = vadd.f32 %v2433_v59, %v861_v36  ;;  %v822_v19 = vpop.f32.mrb[13].mxu1  ;;  %v1828_v11 = vpop.f32.mrb[17].mxu0  ;;  %v867_v58 = vadd.f32 %v820_v29, %v2607_v15 }
 0x960   :  { %v868_v43 = vadd.f32 %v822_v19, %v2599_v12  ;;  %v824_v45 = vpop.f32.mrb[14].mxu1  ;;  %v864_v46 = vpop.f32.mrb[18].mxu0 }
 0x961   :  { %2057 = vtanh.f32 %v900_v42  ;;  %v825_v47 = vpop.f32.mrb[15].mxu1  ;;  %v1829_v60 = vpop.f32.mrb[19].mxu0  ;;  %v1653_v62 = vmul.f32 -1.442695, %v900_v42  ;;  %v1651_v50 = vmul.f32 -1.442695, %v867_v58 }
 0x962   :  { %2059 = vtanh.f32 %v868_v43  ;;  %v1652_v17 = vmul.f32 -1.442695, %v868_v43 }
 0x963   :  { %2061 = vpow2.f32 %v1653_v62 }
 0x964   :  { %2063 = vpow2.f32 %v1651_v50 }
 0x96b   :  { %v2058_v5 = vpop.eup %2057 }
 0x96c   :  { %v2060_v48 = vpop.eup %2059  ;;  %910 = vrot.lane.b32.xlu1 %v2058_v5, %s2201_s12 }
 0x96d   :  { %884 = vrot.lane.b32.xlu0 %v2060_v48, %s2198_s2  ;;  %v2062_v52 = vpop.eup %2061 }
 0x96e   :  { %v2064_v53 = vpop.eup %2063  ;;  %v904_v51 = vadd.f32 1.0, %v2062_v52 }
 0x96f   :  { %v875_v54 = vadd.f32 1.0, %v2064_v53 }
 0x970   :  { %2065 = vrcp.f32 %v904_v51 }
 0x971   :  { %2067 = vrcp.f32 %v875_v54 }
 0x97a   :  { %v2066_v49 = vpop.eup %2065 }
 0x97b   :  { %v2068_v63 = vpop.eup %2067  ;;  %v908_v41 = vmul.f32 %v2066_v49, %v2552_v55 }
 0x97c   :  { %v882_v44 = vmul.f32 %v2068_v63, %v2554_v56 }
 0x9de   :  { %v911_v61 = vpop.permute.xlu1 %910 }
 0x9df   :  { %v913_v0 = vmul.f32 %v2066_v49, %v911_v61  ;;  %v885_v40 = vpop.permute.xlu0 %884 }
 0x9e0   :  { %v887_v2 = vmul.f32 %v2068_v63, %v885_v40 }
 0x9e1   :  { %915 = vrot.lane.b32.xlu1 %v913_v0, %s2201_s12 }
 0x9e2   :  { %889 = vrot.lane.b32.xlu0 %v887_v2, %s2198_s2 }
 0xa53   :  { %v916_v57 = vpop.permute.xlu1 %915 }
 0xa54   :  { %v2614_v3 = vadd.f32 %v916_v57, %v908_v41  ;;  %v890_v4 = vpop.permute.xlu0 %889 }
 0xa55   :  { %v2616_v13 = vadd.f32 %v890_v4, %v882_v44 }
 0xa56   :  { %2069 = vtanh.f32 %v2614_v3 }
 0xa57   :  { %2071 = vtanh.f32 %v2616_v13 }
 0xa58   :  { %2073 = vpow2.f32 %v1652_v17  ;;  %v2149_v17 = vld [vmem:[#allocation4 + $0x18] ss:$12 sps:$4 sm:$0xff]  }
 0xa60   :  { %v2070_v14 = vpop.eup %2069 }
 0xa61   :  { %v2072_v16 = vpop.eup %2071  ;;  %921 = vrot.lane.b32.xlu1 %v2070_v14, %s2201_s12  ;;  %v2677_v14 = vld [vmem:[#allocation4 + $0x8] ss:$12 sps:$4 sm:$0xff]  }
 0xa62   :  { %895 = vrot.lane.b32.xlu0 %v2072_v16, %s2198_s2  ;;  %v2074_v55 = vpop.eup %2073  ;;  %v2148_v16 = vld [vmem:[#allocation4 + $0x1c] ss:$12 sps:$4 sm:$0xff]  }
 0xa63   :  { %v876_v29 = vadd.f32 1.0, %v2074_v55  ;;  %v2684_v55 = vld [vmem:[#allocation4 + $0x20] ss:$12 sps:$4 sm:$0xff]  }
 0xa65   :  { %2075 = vrcp.f32 %v876_v29  ;;  %v2151_v29 = vld [vmem:[#allocation4 + $0x34] ss:$12 sps:$4 sm:$0xff]  }
 0xa6f   :  { %v2076_v36 = vpop.eup %2075 }
 0xad3   :  { %v922_v56 = vpop.permute.xlu1 %921 }
 0xad4   :  { %v896_v42 = vpop.permute.xlu0 %895  ;;  %v924_v11 = vmul.f32 %v2066_v49, %v922_v56  ;;  %v2152_v56 = vld [vmem:[#allocation4 + $0x30] ss:$12 sps:$4 sm:$0xff]  }
 0xad5   :  { %v898_v19 = vmul.f32 %v2076_v36, %v896_v42  ;;  %v2688_v36 = vld [vmem:[#allocation4 + $0x38] ss:$12 sps:$4 sm:$0xff]   ;;  %v2155_v42 = vld [vmem:[#allocation4 + $0x48] ss:$12 sps:$4 sm:$0xff]  }
 0xad7   :  { %899 = vst.msk [vmem:[#allocation2] sm:$0x3] %vm209_vm2, %v898_v19  ;;  %v2692_v19 = vld [vmem:[#allocation4 + $0x50] ss:$12 sps:$4 sm:$0xff]  }
 0xad8   :  { %925 = vst.msk [vmem:[#allocation2] sm:$0x3] %vm490_vm3, %v924_v11  ;;  %v2157_v11 = vld [vmem:[#allocation4 + $0x64] ss:$12 sps:$4 sm:$0xff]  }
 0xadf   :  { %v926_v45 = vld [vmem:[#allocation2] sm:$0x3] }
 0xae0   :  { %v927_v46 = vpack.c.bf16 %v926_v45, %v926_v45  ;;  %v2696_v45 = vld [vmem:[#allocation4 + $0x68] ss:$12 sps:$4 sm:$0xff]  }
 0xae2   :  { %961 = vmatmul.mubr.bf16.vlgmr.msra.gmra.mrb[16].mxu1 %v927_v46  ;;  %1847 = vmatmul.mubr.bf16.vlgmr.msra.gmra.mrb[20].mxu0 %v927_v46  ;;  %v2159_v46 = vld [vmem:[#allocation4 + $0x60] ss:$12 sps:$4 sm:$0xff]  }
 0xae3   :  { %1077 = vmatpush1.bf16.msra.mxu1 %v2284_v6  ;;  %1851 = vmatpush3.bf16.msra.mxu0 %v2286_v7  ;;  %v2145_v6 = vld [vmem:[#allocation4 + $0x4] ss:$12 sps:$4 sm:$0xff]  }
 0xae4   :  { %1078 = vmatprep.subr.bf16.mxu1 %v2288_v8  ;;  %1852 = vmatprep.subr.bf16.mxu0 %v2197_v1 }
 0xae5   :  { %1108 = vmatprep.mubr.bf16.mxu1 %v2199_v39  ;;  %1866 = vmatprep.mubr.msk.bf16.mxu0 %vm2200_vm1, %v2197_v1 }
 0xae7   :  { %1079 = vmatpush1.bf16.msra.mxu1 %v2296_v10  ;;  %1853 = vmatpush3.bf16.msra.mxu0 %v2292_v9  ;;  %v1012_v9 = vrot.slane %v2599_v12, 2 }
 0xae8   :  { %1080 = vmatprep.subr.bf16.mxu1 %v2307_v18  ;;  %1854 = vmatprep.subr.bf16.mxu0 %v2197_v1 }
 0xaeb   :  { %1081 = vmatpush1.bf16.msra.mxu1 %v2312_v20  ;;  %1855 = vmatpush3.bf16.msra.mxu0 %v2314_v21 }
 0xaec   :  { %1082 = vmatprep.subr.bf16.mxu1 %v2320_v22  ;;  %1856 = vmatprep.subr.bf16.mxu0 %v2197_v1 }
 0xaef   :  { %1083 = vmatpush1.bf16.msra.mxu1 %v2323_v23  ;;  %1857 = vmatpush3.bf16.msra.mxu0 %v2325_v24 }
 0xaf0   :  { %1084 = vmatprep.subr.bf16.mxu1 %v2330_v25  ;;  %1858 = vmatprep.subr.bf16.mxu0 %v2197_v1 }
 0xaf3   :  { %1859 = vmatpush3.bf16.msra.mxu0 %v2335_v27  ;;  %1085 = vmatpush1.bf16.msra.mxu1 %v2333_v26 }
 0xaf4   :  { %1086 = vmatprep.subr.bf16.mxu1 %v2340_v28  ;;  %1860 = vmatprep.subr.bf16.mxu0 %v2197_v1  ;;  %v1011_v28 = vrot.slane %v2607_v15, 2 }
 0xaf7   :  { %1087 = vmatpush1.bf16.msra.mxu1 %v2343_v30  ;;  %1861 = vmatpush3.bf16.msra.mxu0 %v2345_v31 }
 0xaf8   :  { %1088 = vmatprep.subr.bf16.mxu1 %v2351_v32  ;;  %1862 = vmatprep.subr.bf16.mxu0 %v2197_v1 }
 0xafb   :  { %1089 = vmatpush1.bf16.msra.mxu1 %v2354_v33  ;;  %1863 = vmatpush3.bf16.msra.mxu0 %v2356_v34 }
 0xafc   :  { %1090 = vmatprep.subr.bf16.mxu1 %v2361_v35  ;;  %1864 = vmatprep.subr.bf16.mxu0 %v2197_v1 }
 0xaff   :  { %1091 = vmatpush1.bf16.msra.mxu1 %v2367_v37  ;;  %1865 = vmatpush3.bf16.msra.mxu0 %v2369_v38 }
 0xb00   :  { %1222 = vmatprep.subr.bf16.mxu1 %v2145_v6  ;;  %1870 = vmatprep.subr.bf16.mxu0 %v2197_v1  ;;  %v2160_v6 = vld [vmem:[#allocation4 + $0x7c] ss:$12 sps:$4 sm:$0xff]  }
 0xbb5   :  { %v962_v7 = vpop.f32.mrb[16].mxu1  ;;  %v1003_v8 = vpop.f32.mrb[20].mxu0 }
 0xbb6   :  { %v1048_v10 = vadd.f32 %v2433_v59, %v1003_v8  ;;  %v964_v18 = vpop.f32.mrb[17].mxu1  ;;  %v1848_v20 = vpop.f32.mrb[21].mxu0  ;;  %v1015_v30 = vadd.f32 %v1011_v28, %v962_v7  ;;  %v2161_v7 = vld [vmem:[#allocation4 + $0x78] ss:$12 sps:$4 sm:$0xff]   ;;  %v2700_v8 = vld [vmem:[#allocation4 + $0x80] ss:$12 sps:$4 sm:$0xff]  }
 0xbb7   :  { %v1016_v21 = vadd.f32 %v1012_v9, %v964_v18  ;;  %v966_v22 = vpop.f32.mrb[18].mxu1  ;;  %v1006_v23 = vpop.f32.mrb[22].mxu0  ;;  %v2163_v9 = vld [vmem:[#allocation4 + $0x94] ss:$12 sps:$4 sm:$0xff]   ;;  %v2704_v18 = vld [vmem:[#allocation4 + $0x98] ss:$12 sps:$4 sm:$0xff]  }
 0xbb8   :  { %2077 = vtanh.f32 %v1048_v10  ;;  %v967_v24 = vpop.f32.mrb[19].mxu1  ;;  %v1849_v25 = vpop.f32.mrb[23].mxu0  ;;  %v1656_v31 = vmul.f32 -1.442695, %v1048_v10  ;;  %v1654_v32 = vmul.f32 -1.442695, %v1015_v30 }
 0xbb9   :  { %2079 = vtanh.f32 %v1016_v21  ;;  %v1655_v61 = vmul.f32 -1.442695, %v1016_v21  ;;  %v2164_v10 = vld [vmem:[#allocation4 + $0x90] ss:$12 sps:$4 sm:$0xff]   ;;  %v2166_v20 = vld [vmem:[#allocation4 + $0xac] ss:$12 sps:$4 sm:$0xff]  }
 0xbba   :  { %2081 = vpow2.f32 %v1656_v31  ;;  %v2167_v21 = vld [vmem:[#allocation4 + $0xa8] ss:$12 sps:$4 sm:$0xff]   ;;  %v2708_v22 = vld [vmem:[#allocation4 + $0xb0] ss:$12 sps:$4 sm:$0xff]   ;;  %v1158_v25 = vrot.slane %v2599_v12, 4 }
 0xbbb   :  { %2083 = vpow2.f32 %v1654_v32 }
 0xbc2   :  { %v2078_v26 = vpop.eup %2077 }
 0xbc3   :  { %v2080_v27 = vpop.eup %2079  ;;  %1058 = vrot.lane.b32.xlu1 %v2078_v26, %s2201_s12 }
 0xbc4   :  { %1032 = vrot.lane.b32.xlu0 %v2080_v27, %s2198_s2  ;;  %v2082_v33 = vpop.eup %2081 }
 0xbc5   :  { %v2084_v34 = vpop.eup %2083  ;;  %v1052_v35 = vadd.f32 1.0, %v2082_v33 }
 0xbc6   :  { %v1023_v37 = vadd.f32 1.0, %v2084_v34 }
 0xbc7   :  { %2085 = vrcp.f32 %v1052_v35 }
 0xbc8   :  { %2087 = vrcp.f32 %v1023_v37 }
 0xbd1   :  { %v2086_v38 = vpop.eup %2085 }
 0xbd2   :  { %v2088_v47 = vpop.eup %2087  ;;  %v1056_v58 = vmul.f32 %v2086_v38, %v2614_v3 }
 0xbd3   :  { %v1030_v50 = vmul.f32 %v2088_v47, %v2616_v13  ;;  %v2146_v13 = vld [vmem:[#allocation4] ss:$12 sps:$4 sm:$0xff]  }
 0xc35   :  { %v1059_v43 = vpop.permute.xlu1 %1058 }
 0xc36   :  { %v1061_v60 = vmul.f32 %v2086_v38, %v1059_v43  ;;  %v1033_v5 = vpop.permute.xlu0 %1032 }
 0xc37   :  { %v1035_v48 = vmul.f32 %v2088_v47, %v1033_v5 }
 0xc38   :  { %1063 = vrot.lane.b32.xlu1 %v1061_v60, %s2201_s12 }
 0xc39   :  { %1037 = vrot.lane.b32.xlu0 %v1035_v48, %s2198_s2 }
 0xcaa   :  { %v1064_v62 = vpop.permute.xlu1 %1063 }
 0xcab   :  { %v2667_v52 = vadd.f32 %v1064_v62, %v1056_v58  ;;  %v1038_v53 = vpop.permute.xlu0 %1037 }
 0xcac   :  { %v2669_v51 = vadd.f32 %v1038_v53, %v1030_v50 }
 0xcad   :  { %2089 = vtanh.f32 %v2667_v52 }
 0xcae   :  { %2091 = vtanh.f32 %v2669_v51 }
 0xcaf   :  { %2093 = vpow2.f32 %v1655_v61 }
 0xcb7   :  { %v2090_v54 = vpop.eup %2089 }
 0xcb8   :  { %v2092_v49 = vpop.eup %2091  ;;  %1069 = vrot.lane.b32.xlu1 %v2090_v54, %s2201_s12 }
 0xcb9   :  { %1043 = vrot.lane.b32.xlu0 %v2092_v49, %s2198_s2  ;;  %v2094_v63 = vpop.eup %2093 }
 0xcba   :  { %v1024_v0 = vadd.f32 1.0, %v2094_v63 }
 0xcbc   :  { %2095 = vrcp.f32 %v1024_v0 }
 0xcc6   :  { %v2096_v2 = vpop.eup %2095 }
 0xd2a   :  { %v1070_v40 = vpop.permute.xlu1 %1069 }
 0xd2b   :  { %v1044_v41 = vpop.permute.xlu0 %1043  ;;  %v1072_v44 = vmul.f32 %v2086_v38, %v1070_v40  ;;  %v1157_v38 = vrot.slane %v2607_v15, 4 }
 0xd2c   :  { %v1046_v57 = vmul.f32 %v2096_v2, %v1044_v41 }
 0xd2e   :  { %1047 = vst.msk [vmem:[#allocation2] sm:$0x3] %vm209_vm2, %v1046_v57 }
 0xd2f   :  { %1073 = vst.msk [vmem:[#allocation2] sm:$0x3] %vm490_vm3, %v1072_v44 }
 0xd36   :  { %v1074_v3 = vld [vmem:[#allocation2] sm:$0x3] }
 0xd37   :  { %v1075_v4 = vpack.c.bf16 %v1074_v3, %v1074_v3 }
 0xd39   :  { %1109 = vmatmul.mubr.bf16.vlgmr.msra.gmra.mrb[20].mxu1 %v1075_v4  ;;  %1867 = vmatmul.mubr.bf16.vlgmr.msra.gmra.mrb[24].mxu0 %v1075_v4 }
 0xd3a   :  { %1223 = vmatpush1.bf16.msra.mxu1 %v2146_v13  ;;  %1871 = vmatpush3.bf16.msra.mxu0 %v2677_v14 }
 0xd3b   :  { %1224 = vmatprep.subr.bf16.mxu1 %v2148_v16  ;;  %1872 = vmatprep.subr.bf16.mxu0 %v2197_v1 }
 0xd3c   :  { %1254 = vmatprep.mubr.bf16.mxu1 %v2199_v39  ;;  %1886 = vmatprep.mubr.msk.bf16.mxu0 %vm2200_vm1, %v2197_v1  ;;  %v2154_v39 = vld [vmem:[#allocation4 + $0x4c] ss:$12 sps:$4 sm:$0xff]  }
 0xd3e   :  { %1225 = vmatpush1.bf16.msra.mxu1 %v2149_v17  ;;  %1873 = vmatpush3.bf16.msra.mxu0 %v2684_v55 }
 0xd3f   :  { %1226 = vmatprep.subr.bf16.mxu1 %v2151_v29  ;;  %1874 = vmatprep.subr.bf16.mxu0 %v2197_v1 }
 0xd42   :  { %1227 = vmatpush1.bf16.msra.mxu1 %v2152_v56  ;;  %1875 = vmatpush3.bf16.msra.mxu0 %v2688_v36 }
 0xd43   :  { %1228 = vmatprep.subr.bf16.mxu1 %v2154_v39  ;;  %1876 = vmatprep.subr.bf16.mxu0 %v2197_v1 }
 0xd46   :  { %1229 = vmatpush1.bf16.msra.mxu1 %v2155_v42  ;;  %1877 = vmatpush3.bf16.msra.mxu0 %v2692_v19 }
 0xd47   :  { %1230 = vmatprep.subr.bf16.mxu1 %v2157_v11  ;;  %1878 = vmatprep.subr.bf16.mxu0 %v2197_v1 }
 0xd4a   :  { %1879 = vmatpush3.bf16.msra.mxu0 %v2696_v45  ;;  %1231 = vmatpush1.bf16.msra.mxu1 %v2159_v46 }
 0xd4b   :  { %1232 = vmatprep.subr.bf16.mxu1 %v2160_v6  ;;  %1880 = vmatprep.subr.bf16.mxu0 %v2197_v1 }
 0xd4e   :  { %1233 = vmatpush1.bf16.msra.mxu1 %v2161_v7  ;;  %1881 = vmatpush3.bf16.msra.mxu0 %v2700_v8 }
 0xd4f   :  { %1234 = vmatprep.subr.bf16.mxu1 %v2163_v9  ;;  %1882 = vmatprep.subr.bf16.mxu0 %v2197_v1 }
 0xd52   :  { %1235 = vmatpush1.bf16.msra.mxu1 %v2164_v10  ;;  %1883 = vmatpush3.bf16.msra.mxu0 %v2704_v18 }
 0xd53   :  { %1236 = vmatprep.subr.bf16.mxu1 %v2166_v20  ;;  %1884 = vmatprep.subr.bf16.mxu0 %v2197_v1 }
 0xd56   :  { %1237 = vmatpush1.bf16.msra.mxu1 %v2167_v21  ;;  %1885 = vmatpush3.bf16.msra.mxu0 %v2708_v22 }
 0xd57   :  { %1890 = vmatprep.subr.bf16.mxu1 %v2197_v1 }
 0xe0c   :  { %v1110_v23 = vpop.f32.mrb[20].mxu1  ;;  %v1151_v24 = vpop.f32.mrb[24].mxu0 }
 0xe0d   :  { %v1194_v26 = vadd.f32 %v2433_v59, %v1151_v24  ;;  %v1112_v27 = vpop.f32.mrb[21].mxu1  ;;  %v1868_v28 = vpop.f32.mrb[25].mxu0  ;;  %v1161_v43 = vadd.f32 %v1157_v38, %v1110_v23 }
 0xe0e   :  { %v1162_v30 = vadd.f32 %v1158_v25, %v1112_v27  ;;  %v1114_v31 = vpop.f32.mrb[22].mxu1  ;;  %v1154_v32 = vpop.f32.mrb[26].mxu0 }
 0xe0f   :  { %2097 = vtanh.f32 %v1194_v26  ;;  %v1115_v33 = vpop.f32.mrb[23].mxu1  ;;  %v1869_v34 = vpop.f32.mrb[27].mxu0  ;;  %v1659_v47 = vmul.f32 -1.442695, %v1194_v26  ;;  %v1657_v59 = vmul.f32 -1.442695, %v1161_v43 }
 0xe10   :  { %2099 = vtanh.f32 %v1162_v30  ;;  %v1658_v4 = vmul.f32 -1.442695, %v1162_v30 }
 0xe11   :  { %2101 = vpow2.f32 %v1659_v47 }
 0xe12   :  { %2103 = vpow2.f32 %v1657_v59 }
 0xe19   :  { %v2098_v35 = vpop.eup %2097 }
 0xe1a   :  { %v2100_v37 = vpop.eup %2099  ;;  %1204 = vrot.lane.b32.xlu1 %v2098_v35, %s2201_s12 }
 0xe1b   :  { %1178 = vrot.lane.b32.xlu0 %v2100_v37, %s2198_s2  ;;  %v2102_v60 = vpop.eup %2101 }
 0xe1c   :  { %v2104_v5 = vpop.eup %2103  ;;  %v1198_v48 = vadd.f32 1.0, %v2102_v60 }
 0xe1d   :  { %v1169_v58 = vadd.f32 1.0, %v2104_v5 }
 0xe1e   :  { %2105 = vrcp.f32 %v1198_v48 }
 0xe1f   :  { %2107 = vrcp.f32 %v1169_v58 }
 0xe28   :  { %v2106_v62 = vpop.eup %2105 }
 0xe29   :  { %v2108_v53 = vpop.eup %2107  ;;  %v1202_v63 = vmul.f32 %v2106_v62, %v2667_v52 }
 0xe2a   :  { %v1176_v40 = vmul.f32 %v2108_v53, %v2669_v51 }
 0xe8c   :  { %v1205_v50 = vpop.permute.xlu1 %1204 }
 0xe8d   :  { %v1207_v54 = vmul.f32 %v2106_v62, %v1205_v50  ;;  %v1179_v49 = vpop.permute.xlu0 %1178 }
 0xe8e   :  { %v1181_v61 = vmul.f32 %v2108_v53, %v1179_v49 }
 0xe8f   :  { %1209 = vrot.lane.b32.xlu1 %v1207_v54, %s2201_s12 }
 0xe90   :  { %1183 = vrot.lane.b32.xlu0 %v1181_v61, %s2198_s2 }
 0xf01   :  { %v1210_v0 = vpop.permute.xlu1 %1209 }
 0xf02   :  { %v2721_v2 = vadd.f32 %v1210_v0, %v1202_v63  ;;  %v1184_v41 = vpop.permute.xlu0 %1183 }
 0xf03   :  { %v2723_v57 = vadd.f32 %v1184_v41, %v1176_v40 }
 0xf04   :  { %2109 = vtanh.f32 %v2721_v2 }
 0xf05   :  { %2111 = vtanh.f32 %v2723_v57 }
 0xf06   :  { %2113 = vpow2.f32 %v1658_v4 }
 0xf0e   :  { %v2110_v44 = vpop.eup %2109 }
 0xf0f   :  { %v2112_v3 = vpop.eup %2111  ;;  %1215 = vrot.lane.b32.xlu1 %v2110_v44, %s2201_s12 }
 0xf10   :  { %1189 = vrot.lane.b32.xlu0 %v2112_v3, %s2198_s2  ;;  %v2114_v52 = vpop.eup %2113 }
 0xf11   :  { %v1170_v13 = vadd.f32 1.0, %v2114_v52 }
 0xf13   :  { %2115 = vrcp.f32 %v1170_v13 }
 0xf1d   :  { %v2116_v16 = vpop.eup %2115 }
 0xf81   :  { %v1216_v51 = vpop.permute.xlu1 %1215 }
 0xf82   :  { %v1190_v17 = vpop.permute.xlu0 %1189  ;;  %v1218_v56 = vmul.f32 %v2106_v62, %v1216_v51 }
 0xf83   :  { %v1192_v29 = vmul.f32 %v2116_v16, %v1190_v17 }
 0xf85   :  { %1193 = vst.msk [vmem:[#allocation2] sm:$0x3] %vm209_vm2, %v1192_v29 }
 0xf86   :  { %1219 = vst.msk [vmem:[#allocation2] sm:$0x3] %vm490_vm3, %v1218_v56 }
 0xf8d   :  { %v1220_v39 = vld [vmem:[#allocation2] sm:$0x3] }
 0xf8e   :  { %v1221_v42 = vpack.c.bf16 %v1220_v39, %v1220_v39  ;;  %v1434_v39 = vld [vmem:[%s2813_s5] sm:$0xff] }
 0xf90   :  { %1255 = vmatmul.mubr.bf16.vlgmr.msra.gmra.mrb[24].mxu1 %v1221_v42  ;;  %1887 = vmatmul.mubr.bf16.vlgmr.msra.gmra.mrb[28].mxu0 %v1221_v42  ;;  %v1435_v42 = vld [vmem:[%s2813_s5 + $0x8] sm:$0xff] }
 0xf91   :  { %1891 = vmatpush3.bf16.msra.mxu1 %v2677_v14  ;;  %1906 = vmatprep.mubr.msk.bf16.mxu1 %vm2200_vm1, %v2197_v1 }
 0xf92   :  { %1892 = vmatprep.subr.bf16.mxu1 %v2197_v1  ;;  %1918 = vmatprep.mubr.msk.f32.mxu0 %vm2200_vm1, %v2197_v1 }
 0xf95   :  { %1893 = vmatpush3.bf16.msra.mxu1 %v2684_v55 }
 0xf96   :  { %1894 = vmatprep.subr.bf16.mxu1 %v2197_v1 }
 0xf99   :  { %1895 = vmatpush3.bf16.msra.mxu1 %v2688_v36  ;;  %v1304_v36 = vrot.slane %v2599_v12, 6  ;;  %v1303_v12 = vrot.slane %v2607_v15, 6 }
 0xf9a   :  { %1896 = vmatprep.subr.bf16.mxu1 %v2197_v1 }
 0xf9d   :  { %1897 = vmatpush3.bf16.msra.mxu1 %v2692_v19  ;;  %v2754_v19 = vld [vmem:[%s2812_s4] ss:$0 sm:$0xff] }
 0xf9e   :  { %1898 = vmatprep.subr.bf16.mxu1 %v2197_v1 }
 0xfa1   :  { %1899 = vmatpush3.bf16.msra.mxu1 %v2696_v45 }
 0xfa2   :  { %1900 = vmatprep.subr.bf16.mxu1 %v2197_v1 }
 0xfa5   :  { %1901 = vmatpush3.bf16.msra.mxu1 %v2700_v8 }
 0xfa6   :  { %1902 = vmatprep.subr.bf16.mxu1 %v2197_v1 }
 0xfa9   :  { %1903 = vmatpush3.bf16.msra.mxu1 %v2704_v18 }
 0xfaa   :  { %1904 = vmatprep.subr.bf16.mxu1 %v2197_v1 }
 0xfad   :  { %1905 = vmatpush3.bf16.msra.mxu1 %v2708_v22 }
0x1063   :  { %v1256_v14 = vpop.f32.mrb[24].mxu1  ;;  %v1297_v55 = vpop.f32.mrb[28].mxu0 }
0x1064   :  { %v1340_v11 = vadd.f32 %v2754_v19, %v1297_v55  ;;  %v1258_v45 = vpop.f32.mrb[25].mxu1  ;;  %v1888_v46 = vpop.f32.mrb[29].mxu0  ;;  %v1307_v21 = vadd.f32 %v1303_v12, %v1256_v14  ;;  %v1436_v14 = vld [vmem:[%s2813_s5 + $0x10] sm:$0xff]  ;;  %v2202_v55 = vmov 0.0|0.0  }
0x1065   :  { %v1308_v6 = vadd.f32 %v1304_v36, %v1258_v45  ;;  %v1260_v7 = vpop.f32.mrb[26].mxu1  ;;  %v1300_v8 = vpop.f32.mrb[30].mxu0  ;;  %1932 = vmatprep.subr.bf16.mxu0 %v2202_v55  ;;  %v1933_v36 = vpack.c.bf16 %v1435_v42, %v1434_v39 }
0x1066   :  { %2117 = vtanh.f32 %v1340_v11  ;;  %v1261_v9 = vpop.f32.mrb[27].mxu1  ;;  %v1889_v10 = vpop.f32.mrb[31].mxu0  ;;  %v1662_v22 = vmul.f32 -1.442695, %v1340_v11  ;;  %v1660_v23 = vmul.f32 -1.442695, %v1307_v21 }
0x1067   :  { %2119 = vtanh.f32 %v1308_v6  ;;  %v1661_v5 = vmul.f32 -1.442695, %v1308_v6  ;;  %1934 = vmatpush3.bf16.msra.mxu0 %v1933_v36  ;;  %v1522_v7 = vld [vmem:[%s2815_s7] sm:$0xff]  ;;  %v1523_v8 = vld [vmem:[%s2815_s7 + $0x8] sm:$0xff] }
0x1068   :  { %2121 = vpow2.f32 %v1662_v22  ;;  %1935 = vmatprep.subr.bf16.mxu0 %v2202_v55  ;;  %v1939_v9 = vpack.c.bf16 %v1523_v8, %v1522_v7  ;;  %v1664_v21 = vld [vmem:[%s2814_s6] ss:$0 sm:$0xff] }
0x1069   :  { %2123 = vpow2.f32 %v1660_v23 }
0x1070   :  { %v2118_v18 = vpop.eup %2117 }
0x1071   :  { %v2120_v20 = vpop.eup %2119  ;;  %1350 = vrot.lane.b32.xlu1 %v2118_v18, %s2201_s12  ;;  %v1524_v18 = vld [vmem:[%s2815_s7 + $0x10] sm:$0xff] }
0x1072   :  { %1324 = vrot.lane.b32.xlu0 %v2120_v20, %s2198_s2  ;;  %v2122_v24 = vpop.eup %2121  ;;  %v1525_v20 = vld [vmem:[%s2815_s7 + $0x18] sm:$0xff] }
0x1073   :  { %v2124_v25 = vpop.eup %2123  ;;  %v1344_v26 = vadd.f32 1.0, %v2122_v24  ;;  %v1942_v12 = vpack.c.bf16 %v1525_v20, %v1524_v18 }
0x1074   :  { %v1315_v27 = vadd.f32 1.0, %v2124_v25 }
0x1075   :  { %2125 = vrcp.f32 %v1344_v26 }
0x1076   :  { %2127 = vrcp.f32 %v1315_v27 }
0x107f   :  { %v2126_v28 = vpop.eup %2125 }
0x1080   :  { %v2128_v31 = vpop.eup %2127  ;;  %v1348_v15 = vmul.f32 %v2126_v28, %v2721_v2 }
0x1081   :  { %v1322_v37 = vmul.f32 %v2128_v31, %v2723_v57 }
0x10e3   :  { %v1351_v30 = vpop.permute.xlu1 %1350 }
0x10e4   :  { %v1353_v32 = vmul.f32 %v2126_v28, %v1351_v30  ;;  %v1325_v33 = vpop.permute.xlu0 %1324 }
0x10e5   :  { %v1327_v34 = vmul.f32 %v2128_v31, %v1325_v33 }
0x10e6   :  { %1355 = vrot.lane.b32.xlu1 %v1353_v32, %s2201_s12 }
0x10e7   :  { %1329 = vrot.lane.b32.xlu0 %v1327_v34, %s2198_s2 }
0x1158   :  { %v1356_v35 = vpop.permute.xlu1 %1355 }
0x1159   :  { %v1358_v38 = vadd.f32 %v1356_v35, %v1348_v15  ;;  %v1330_v43 = vpop.permute.xlu0 %1329 }
0x115a   :  { %v1332_v47 = vadd.f32 %v1330_v43, %v1322_v37 }
0x115b   :  { %2129 = vtanh.f32 %v1358_v38 }
0x115c   :  { %2131 = vtanh.f32 %v1332_v47 }
0x115d   :  { %2133 = vpow2.f32 %v1661_v5 }
0x1165   :  { %v2130_v59 = vpop.eup %2129 }
0x1166   :  { %v2132_v60 = vpop.eup %2131  ;;  %1361 = vrot.lane.b32.xlu1 %v2130_v59, %s2201_s12 }
0x1167   :  { %1335 = vrot.lane.b32.xlu0 %v2132_v60, %s2198_s2  ;;  %v2134_v48 = vpop.eup %2133 }
0x1168   :  { %v1316_v58 = vadd.f32 1.0, %v2134_v48 }
0x116a   :  { %2135 = vrcp.f32 %v1316_v58 }
0x1174   :  { %v2136_v50 = vpop.eup %2135 }
0x11d8   :  { %v1362_v62 = vpop.permute.xlu1 %1361 }
0x11d9   :  { %v1336_v53 = vpop.permute.xlu0 %1335  ;;  %v1364_v49 = vmul.f32 %v2126_v28, %v1362_v62 }
0x11da   :  { %v1338_v54 = vmul.f32 %v2136_v50, %v1336_v53 }
0x11dc   :  { %1339 = vst.msk [vmem:[#allocation2] sm:$0x3] %vm209_vm2, %v1338_v54 }
0x11dd   :  { %1365 = vst.msk [vmem:[#allocation2] sm:$0x3] %vm490_vm3, %v1364_v49 }
0x11e4   :  { %v1366_v61 = vld [vmem:[#allocation2] sm:$0x3] }
0x11e5   :  { %v1367_v63 = vpack.c.bf16 %v1366_v61, %v1366_v61 }
0x11e7   :  { %1907 = vmatmul.mubr.bf16.vlgmr.msra.gmra.mrb[28].mxu1 %v1367_v63 }
0x12ba   :  { %v1402_v0 = vpop.f32.mrb[28].mxu1 }
0x12bb   :  { %v1408_v40 = vadd.f32 %v2754_v19, %v1402_v0  ;;  %v1908_v2 = vpop.f32.mrb[29].mxu1  ;;  %v1437_v19 = vld [vmem:[%s2813_s5 + $0x18] sm:$0xff] }
0x12bc   :  { %v1405_v41 = vpop.f32.mrb[30].mxu1  ;;  %v1936_v11 = vpack.c.bf16 %v1437_v19, %v1436_v14 }
0x12bd   :  { %2137 = vtanh.f32 %v1408_v40  ;;  %v1909_v57 = vpop.f32.mrb[31].mxu1  ;;  %v1663_v3 = vmul.f32 -1.442695, %v1408_v40 }
0x12be   :  { %1937 = vmatpush3.bf16.msra.mxu0 %v1936_v11 }
0x12bf   :  { %2139 = vpow2.f32 %v1663_v3  ;;  %1938 = vmatprep.subr.bf16.mxu0 %v2202_v55 }
0x12c7   :  { %v2138_v44 = vpop.eup %2137 }
0x12c8   :  { %1418 = vrot.lane.b32.xlu0 %v2138_v44, %s2201_s12 }
0x12c9   :  { %v2140_v4 = vpop.eup %2139 }
0x12ca   :  { %v1412_v52 = vadd.f32 1.0, %v2140_v4 }
0x12cc   :  { %2141 = vrcp.f32 %v1412_v52 }
0x12d6   :  { %v2142_v13 = vpop.eup %2141 }
0x12d7   :  { %v1416_v17 = vmul.f32 %v2142_v13, %v1358_v38 }
0x133a   :  { %v1419_v51 = vpop.permute.xlu0 %1418 }
0x133b   :  { %v1421_v16 = vmul.f32 %v2142_v13, %v1419_v51 }
0x133d   :  { %1423 = vrot.lane.b32.xlu1 %v1421_v16, %s2201_s12 }
0x13af   :  { %v1424_v29 = vpop.permute.xlu1 %1423 }
0x13b0   :  { %v1426_v56 = vadd.f32 %v1424_v29, %v1416_v17 }
0x13b2   :  { %2143 = vtanh.f32 %v1426_v56 }
0x13bc   :  { %v2144_v45 = vpop.eup %2143 }
0x13bd   :  { %1429 = vrot.lane.b32.xlu0 %v2144_v45, %s2201_s12 }
0x142f   :  { %v1430_v46 = vpop.permute.xlu0 %1429 }
0x1430   :  { %v1432_v6 = vmul.f32 %v2142_v13, %v1430_v46 }
0x1432   :  { %1433 = vst.msk [vmem:[#allocation2] sm:$0x3] %vm490_vm3, %v1432_v6  ;;  %1446 = vrot.lane.b32.xlu1 %v1432_v6, %s2198_s2 }
0x14a4   :  { %v1447_v10 = vpop.permute.xlu1 %1446 }
0x14a5   :  { %1919 = vmatmul.mubr.msk.f32.vlgmr.msra.gmra.mrb[32].mxu0 %vm1448_vm4, %v1447_v10 }
0x14a6   :  { %1940 = vmatpush3.bf16.msra.mxu0 %v1939_v9  ;;  %1929 = vmatprep.mubr.msk.f32.mxu0 %vm2200_vm1, %v2197_v1  ;;  %v1666_v1 = vld [vmem:[#allocation3] ss:$0 sm:$0xff] }
0x14a7   :  { %1941 = vmatprep.subr.bf16.mxu0 %v2202_v55 }
0x14aa   :  { %1943 = vmatpush3.bf16.msra.mxu0 %v1942_v12 }
0x1578   :  { %v1517_v22 = vpop.f32.mrb[32].mxu0 }
0x1579   :  { %v1518_v23 = vadd.f32 %v1664_v21, %v1517_v22  ;;  %v1920_v24 = vpop.f32.mrb[33].mxu0 }
0x157b   :  { %v1521_v25 = vmax.f32 %v1518_v23, 0.0 }
0x157d   :  { %1930 = vmatmul.mubr.msk.f32.vlgmr.msra.gmra.mrb[34].mxu0 %vm1448_vm4, %v1521_v25 }
0x1650   :  { %v1602_v26 = vpop.f32.mrb[34].mxu0 }
0x1651   :  { %v1603_v27 = vadd.f32 %v1666_v1, %v1602_v26  ;;  %v1931_v28 = vpop.f32.mrb[35].mxu0 }
0x1653   :  { %1607 = vst.msk [vmem:[%s2817_s9] sm:$0x3] %vm1606_vm5, %v1603_v27 }
0x1654   :  { %1612 = vsyncpa [#allocation5], 1 }

</bundles_post_ra>
